<compile_context>
chip_gen: v7x
topology: tpu7x:2x2x1
jax: 0.10.0
libtpu: 0.0.40
codegen_flags: <defaults>
</compile_context>

<pallas_src>
import functools

import jax
import jax.numpy as jnp
import numpy as np
from jax.experimental import pallas as pl
from jax.experimental.pallas import tpu as pltpu  # noqa: F401 (TPU backend)

_LANE = 128  # lane-pad small head outputs to one full vreg lane width


# ------------------------------ in-kernel helpers ----------------------------


def _ln_f32(x, g, b, eps):
    mean = jnp.mean(x, axis=-1, keepdims=True)
    var = jnp.mean((x - mean) ** 2, axis=-1, keepdims=True)
    return (x - mean) * jax.lax.rsqrt(var + eps) * g + b


def _gelu_exact(x):
    # exact (erf-based) GELU, matches nn.GELU default
    return 0.5 * x * (1.0 + jax.lax.erf(x * (1.0 / np.sqrt(2.0))))


# ------------------------------ fused forward kernel -------------------------


def _fused_forward_kernel(
    # inputs ------------------------------------------------------------
    ids_ref, maskadd_ref, word_emb_ref, pos_emb_ref, emb_g_ref, emb_b_ref,
    wqkv_ref, bqkv_ref, wo_ref, bo_ref, ln1_g_ref, ln1_b_ref,
    w1_ref, b1_ref, w2_ref, b2_ref, ln2_g_ref, ln2_b_ref,
    lm_wt_ref, lm_bt_ref, lm_g_ref, lm_b_ref, lm_wp_ref, lm_bp_ref,
    cls_w1_ref, cls_b1_ref, cls_w2_ref, cls_b2_ref,
    # outputs -----------------------------------------------------------
    hs_ref, last_ref, lm_ref, cls_ref,
    *, B, S, D, H, n_layers, eps):
    BS = B * S
    Dh = D // H
    V = word_emb_ref.shape[0]
    scale = 1.0 / (Dh ** 0.5)

    # ---- embeddings: one-hot(ids) @ word_emb (exact row gather on the MXU) --
    ids = ids_ref[...]                                         # (BS, 1) int32
    lane_iota = jax.lax.broadcasted_iota(jnp.int32, (BS, V), 1)
    onehot = (lane_iota == ids).astype(jnp.float32)            # (BS, V)
    emb = jnp.dot(onehot, word_emb_ref[...],
                  preferred_element_type=jnp.float32)          # (BS, D)
    pos = jnp.concatenate([pos_emb_ref[...]] * B, axis=0)      # (BS, D)
    x = _ln_f32(emb + pos, emb_g_ref[...], emb_b_ref[...], eps)

    hs_ref[0] = x.astype(hs_ref.dtype)

    madd_all = maskadd_ref[...]                                # (B, S) additive

    # ---- transformer layers (fully unrolled, everything stays on-chip) ------
    for l in range(n_layers):
        # fused QKV projection: one MXU pass with N = 3D
        qkv = jnp.dot(x, wqkv_ref[l],
                      preferred_element_type=jnp.float32) + bqkv_ref[l]
        q = qkv[:, 0 * D:1 * D]
        k = qkv[:, 1 * D:2 * D]
        v = qkv[:, 2 * D:3 * D]

        ctx_rows = []
        for b in range(B):
            qb = q[b * S:(b + 1) * S, :]
            kb = k[b * S:(b + 1) * S, :]
            vb = v[b * S:(b + 1) * S, :]
            madd = madd_all[b:b + 1, :]                        # (1, S)
            heads = []
            for h in range(H):
                qh = qb[:, h * Dh:(h + 1) * Dh]                # (S, Dh)
                kh = kb[:, h * Dh:(h + 1) * Dh]
                vh = vb[:, h * Dh:(h + 1) * Dh]
                # q·kᵀ via dot_general contracting last dims (no explicit k.T)
                s = jax.lax.dot_general(
                    qh, kh, (((1,), (1,)), ((), ())),
                    preferred_element_type=jnp.float32) * scale
                s = s + madd                                   # mask key positions
                s = s - jnp.max(s, axis=-1, keepdims=True)
                p = jnp.exp(s)
                p = p / jnp.sum(p, axis=-1, keepdims=True)
                heads.append(jnp.dot(p, vh,
                                     preferred_element_type=jnp.float32))
            ctx_rows.append(jnp.concatenate(heads, axis=-1))   # (S, D)
        ctx = jnp.concatenate(ctx_rows, axis=0)                # (BS, D)

        attn_out = jnp.dot(ctx, wo_ref[l],
                           preferred_element_type=jnp.float32) + bo_ref[l]
        h1 = _ln_f32(x + attn_out, ln1_g_ref[l], ln1_b_ref[l], eps)

        ff = jnp.dot(h1, w1_ref[l],
                     preferred_element_type=jnp.float32) + b1_ref[l]
        ff = _gelu_exact(ff)
        ff = jnp.dot(ff, w2_ref[l],
                     preferred_element_type=jnp.float32) + b2_ref[l]
        x = _ln_f32(h1 + ff, ln2_g_ref[l], ln2_b_ref[l], eps)

        hs_ref[l + 1] = x.astype(hs_ref.dtype)

    last_ref[...] = x.astype(last_ref.dtype)

    # ---- lm head: vocab_transform -> GELU -> vocab_layer_norm -> projector --
    hlm = jnp.dot(x, lm_wt_ref[...],
                  preferred_element_type=jnp.float32) + lm_bt_ref[...]
    hlm = _gelu_exact(hlm)
    hlm = _ln_f32(hlm, lm_g_ref[...], lm_b_ref[...], eps)
    lm = jnp.dot(hlm, lm_wp_ref[...],
                 preferred_element_type=jnp.float32) + lm_bp_ref[...]
    lm_ref[...] = lm.astype(lm_ref.dtype)          # lane-dense (BS, 128) store

    # ---- cls head: dense -> ReLU -> decoder ---------------------------------
    hc = jnp.dot(x, cls_w1_ref[...],
                 preferred_element_type=jnp.float32) + cls_b1_ref[...]
    hc = jnp.maximum(hc, 0.0)
    c = jnp.dot(hc, cls_w2_ref[...],
                preferred_element_type=jnp.float32) + cls_b2_ref[...]
    cls_ref[...] = c.astype(cls_ref.dtype)         # lane-dense (BS, 128) store


# ------------------------------ params & packing ------------------------------


class Cfg:
    vocab = 64
    max_pos = 16
    dim = 32
    n_heads = 2
    n_layers = 2
    ffn = 64
    head_size = 1          # cls_head input = dim * head_size
    cls_hidden = dim // 2  # 16
    n_cls = 2


def init_params(key, cfg):
    def nrm(key, shape, scale=0.02):
        return scale * jax.random.normal(key, shape, dtype=jnp.float32)

    keys = iter(jax.random.split(key, 128))
    p = {}
    p["word_emb"] = nrm(next(keys), (cfg.vocab, cfg.dim))
    p["pos_emb"] = nrm(next(keys), (cfg.max_pos, cfg.dim))
    p["emb_ln_g"] = jnp.ones((cfg.dim,), jnp.float32)
    p["emb_ln_b"] = jnp.zeros((cfg.dim,), jnp.float32)

    p["layers"] = []
    for _ in range(cfg.n_layers):
        L = {}
        for name in ["q", "k", "v", "o"]:
            L[f"W{name}"] = nrm(next(keys), (cfg.dim, cfg.dim))
            L[f"b{name}"] = jnp.zeros((cfg.dim,), jnp.float32)
        L["ln1_g"] = jnp.ones((cfg.dim,), jnp.float32)
        L["ln1_b"] = jnp.zeros((cfg.dim,), jnp.float32)
        L["W1"] = nrm(next(keys), (cfg.dim, cfg.ffn))
        L["b1"] = jnp.zeros((cfg.ffn,), jnp.float32)
        L["W2"] = nrm(next(keys), (cfg.ffn, cfg.dim))
        L["b2"] = jnp.zeros((cfg.dim,), jnp.float32)
        L["ln2_g"] = jnp.ones((cfg.dim,), jnp.float32)
        L["ln2_b"] = jnp.zeros((cfg.dim,), jnp.float32)
        p["layers"].append(L)

    # lm_head: vocab_transform -> GELU -> vocab_layer_norm -> vocab_projector
    p["lm_Wt"] = nrm(next(keys), (cfg.dim, cfg.dim))
    p["lm_bt"] = jnp.zeros((cfg.dim,), jnp.float32)
    p["lm_ln_g"] = jnp.ones((cfg.dim,), jnp.float32)
    p["lm_ln_b"] = jnp.zeros((cfg.dim,), jnp.float32)
    p["lm_Wp"] = nrm(next(keys), (cfg.dim, cfg.vocab))
    p["lm_bp"] = jnp.zeros((cfg.vocab,), jnp.float32)

    # cls_head: Linear(dim*head_size, dim//2) -> ReLU -> Linear(dim//2, 2)
    p["cls_W1"] = nrm(next(keys), (cfg.dim * cfg.head_size, cfg.cls_hidden))
    p["cls_b1"] = jnp.zeros((cfg.cls_hidden,), jnp.float32)
    p["cls_W2"] = nrm(next(keys), (cfg.cls_hidden, cfg.n_cls))
    p["cls_b2"] = jnp.zeros((cfg.n_cls,), jnp.float32)
    return p


def pack_params(p, cfg):
    """One-time packing: stack per-layer weights, fuse QKV, lane-pad heads."""
    D, F, V = cfg.dim, cfg.ffn, cfg.vocab

    def stack_w(name):
        return jnp.stack([layer[name] for layer in p["layers"]], axis=0)

    def stack_r(name, n):  # (L, 1, n) so ref[l] yields a broadcastable (1, n)
        return jnp.stack([layer[name].reshape(1, n) for layer in p["layers"]],
                         axis=0)

    return {
        "word_emb": p["word_emb"],
        "pos_emb": p["pos_emb"],
        "emb_ln_g": p["emb_ln_g"].reshape(1, D),
        "emb_ln_b": p["emb_ln_b"].reshape(1, D),
        # fused QKV projection: (L, D, 3D) / (L, 1, 3D)
        "Wqkv": jnp.stack(
            [jnp.concatenate([l["Wq"], l["Wk"], l["Wv"]], axis=1)
             for l in p["layers"]], axis=0),
        "bqkv": jnp.stack(
            [jnp.concatenate([l["bq"], l["bk"], l["bv"]],
                             axis=0).reshape(1, 3 * D)
             for l in p["layers"]], axis=0),
        "Wo": stack_w("Wo"), "bo": stack_r("bo", D),
        "ln1_g": stack_r("ln1_g", D), "ln1_b": stack_r("ln1_b", D),
        "W1": stack_w("W1"), "b1": stack_r("b1", F),
        "W2": stack_w("W2"), "b2": stack_r("b2", D),
        "ln2_g": stack_r("ln2_g", D), "ln2_b": stack_r("ln2_b", D),
        "lm_Wt": p["lm_Wt"], "lm_bt": p["lm_bt"].reshape(1, D),
        "lm_ln_g": p["lm_ln_g"].reshape(1, D),
        "lm_ln_b": p["lm_ln_b"].reshape(1, D),
        # lane-pad the small-N head projections to 128 for unmasked stores
        "lm_Wp": jnp.pad(p["lm_Wp"], ((0, 0), (0, _LANE - V))),
        "lm_bp": jnp.pad(p["lm_bp"].reshape(1, V), ((0, 0), (0, _LANE - V))),
        "cls_W1": p["cls_W1"],
        "cls_b1": p["cls_b1"].reshape(1, cfg.cls_hidden),
        "cls_W2": jnp.pad(p["cls_W2"], ((0, 0), (0, _LANE - cfg.n_cls))),
        "cls_b2": jnp.pad(p["cls_b2"].reshape(1, cfg.n_cls),
                          ((0, 0), (0, _LANE - cfg.n_cls))),
    }


# ------------------------------ forward wrapper -------------------------------


def language_model_forward(packed, input_ids, attention_mask, cfg,
                           output_hidden_states=True, output_lm=True,
                           output_cls=True):
    # TODO(synk): output_attentions (per-head attention maps) are not returned.
    B, S = input_ids.shape
    D, H, L, V = cfg.dim, cfg.n_heads, cfg.n_layers, cfg.vocab
    BS = B * S
    assert V <= _LANE and cfg.n_cls <= _LANE

    ids2d = input_ids.reshape(BS, 1).astype(jnp.int32)
    mask_add = (1.0 - attention_mask.astype(jnp.float32)) * -1e9   # (B, S)

    kernel = functools.partial(
        _fused_forward_kernel, B=B, S=S, D=D, H=H, n_layers=L, eps=1e-12)

    out_shape = (
        jax.ShapeDtypeStruct((L + 1, BS, D), jnp.float32),   # hidden states
        jax.ShapeDtypeStruct((BS, D), jnp.float32),          # last hidden
        jax.ShapeDtypeStruct((BS, _LANE), jnp.float32),      # lm logits (padded)
        jax.ShapeDtypeStruct((BS, _LANE), jnp.float32),      # cls logits (padded)
    )

    # Single fused launch: no grid, every operand is one full-array VMEM block.
    hs, last, lm_pad, cls_pad = pl.pallas_call(
        kernel, out_shape=out_shape,
    )(
        ids2d, mask_add,
        packed["word_emb"], packed["pos_emb"][:S],
        packed["emb_ln_g"], packed["emb_ln_b"],
        packed["Wqkv"], packed["bqkv"], packed["Wo"], packed["bo"],
        packed["ln1_g"], packed["ln1_b"],
        packed["W1"], packed["b1"], packed["W2"], packed["b2"],
        packed["ln2_g"], packed["ln2_b"],
        packed["lm_Wt"], packed["lm_bt"], packed["lm_ln_g"], packed["lm_ln_b"],
        packed["lm_Wp"], packed["lm_bp"],
        packed["cls_W1"], packed["cls_b1"], packed["cls_W2"], packed["cls_b2"],
    )

    out = {"last_hidden_state": last.reshape(B, S, D),
           "hidden_states": None, "lm_logits": None, "cls_logits": None}
    if output_hidden_states:
        # (L+1, B*S, D) -> (B, S, L+1, D)  == torch.stack(...).permute(1,2,0,3)
        out["hidden_states"] = hs.transpose(1, 0, 2).reshape(B, S, L + 1, D)
    if output_lm:
        out["lm_logits"] = lm_pad[:, :V].reshape(B, S, V)
    if output_cls:
        out["cls_logits"] = cls_pad[:, :cfg.n_cls].reshape(B, S, cfg.n_cls)
    return out


# ------------------------------ pure-JAX reference ----------------------------


def reference_forward(params, input_ids, attention_mask, cfg):
    B, S = input_ids.shape
    D, H = cfg.dim, cfg.n_heads
    Dh = D // H
    eps = 1e-12

    def ln(x, g, b):
        m = jnp.mean(x, axis=-1, keepdims=True)
        var = jnp.mean((x - m) ** 2, axis=-1, keepdims=True)
        return (x - m) * jax.lax.rsqrt(var + eps) * g + b

    def gelu(x):
        return 0.5 * x * (1.0 + jax.lax.erf(x / np.sqrt(2.0)))

    x = params["word_emb"][input_ids] + params["pos_emb"][:S][None, :, :]
    x = ln(x, params["emb_ln_g"], params["emb_ln_b"])
    hidden = [x]
    madd = (1.0 - attention_mask.astype(jnp.float32)) * -1e9

    for Lp in params["layers"]:
        q = (x @ Lp["Wq"] + Lp["bq"]).reshape(B, S, H, Dh).transpose(0, 2, 1, 3)
        k = (x @ Lp["Wk"] + Lp["bk"]).reshape(B, S, H, Dh).transpose(0, 2, 1, 3)
        v = (x @ Lp["Wv"] + Lp["bv"]).reshape(B, S, H, Dh).transpose(0, 2, 1, 3)
        s = jnp.einsum("bhqd,bhkd->bhqk", q, k) / np.sqrt(Dh)
        s = s + madd[:, None, None, :]
        p = jax.nn.softmax(s, axis=-1)
        ctx = jnp.einsum("bhqk,bhkd->bhqd", p, v)
        ctx = ctx.transpose(0, 2, 1, 3).reshape(B, S, D)
        a = ctx @ Lp["Wo"] + Lp["bo"]
        h = ln(x + a, Lp["ln1_g"], Lp["ln1_b"])
        f = gelu(h @ Lp["W1"] + Lp["b1"]) @ Lp["W2"] + Lp["b2"]
        x = ln(h + f, Lp["ln2_g"], Lp["ln2_b"])
        hidden.append(x)

    out = {"last_hidden_state": x}
    out["hidden_states"] = jnp.stack(hidden, axis=0).transpose(1, 2, 0, 3)
    hlm = ln(gelu(x @ params["lm_Wt"] + params["lm_bt"]),
             params["lm_ln_g"], params["lm_ln_b"])
    out["lm_logits"] = hlm @ params["lm_Wp"] + params["lm_bp"]
    hc = jnp.maximum(x @ params["cls_W1"] + params["cls_b1"], 0.0)
    out["cls_logits"] = hc @ params["cls_W2"] + params["cls_b2"]
    return out


# --------------------------------- main ---------------------------------------

if __name__ == "__main__":
    cfg = Cfg()
    key = jax.random.PRNGKey(0)
    k_param, k_ids = jax.random.split(key)

    params = init_params(k_param, cfg)
    packed = pack_params(params, cfg)

    B, S = 2, 8
    input_ids = jax.random.randint(k_ids, (B, S), 0, cfg.vocab, dtype=jnp.int32)
    attention_mask = jnp.ones((B, S), jnp.float32).at[1, -2:].set(0.0)  # pad tail

    fwd = jax.jit(lambda pk, ids, m: language_model_forward(pk, ids, m, cfg))
    outputs = fwd(packed, input_ids, attention_mask)
    jax.block_until_ready(outputs)

    assert outputs["last_hidden_state"].shape == (B, S, cfg.dim)
    assert outputs["hidden_states"].shape == (B, S, cfg.n_layers + 1, cfg.dim)
    assert outputs["lm_logits"].shape == (B, S, cfg.vocab)
    assert outputs["cls_logits"].shape == (B, S, cfg.n_cls)
    assert all(bool(jnp.all(jnp.isfinite(v)))
               for v in outputs.values() if v is not None)

    # numerical check against a pure-JAX reference of the same forward pass
    ref = reference_forward(params, input_ids, attention_mask, cfg)
    for name in ["last_hidden_state", "hidden_states", "lm_logits", "cls_logits"]:
        np.testing.assert_allclose(np.asarray(outputs[name]),
                                   np.asarray(ref[name]),
                                   rtol=2e-2, atol=2e-2)

    print("KERNEL_OK")
</pallas_src>

<mosaic_0001>
module attributes {stable_mosaic.version = 11 : i64} {
  func.func @_fused_forward_kernel(%arg0: memref<16x1xi32, #tpu.memory_space<vmem>>, %arg1: memref<2x8xf32, #tpu.memory_space<vmem>>, %arg2: memref<64x32xf32, #tpu.memory_space<vmem>>, %arg3: memref<8x32xf32, #tpu.memory_space<vmem>>, %arg4: memref<1x32xf32, #tpu.memory_space<vmem>>, %arg5: memref<1x32xf32, #tpu.memory_space<vmem>>, %arg6: memref<2x32x96xf32, #tpu.memory_space<vmem>>, %arg7: memref<2x1x96xf32, #tpu.memory_space<vmem>>, %arg8: memref<2x32x32xf32, #tpu.memory_space<vmem>>, %arg9: memref<2x1x32xf32, #tpu.memory_space<vmem>>, %arg10: memref<2x1x32xf32, #tpu.memory_space<vmem>>, %arg11: memref<2x1x32xf32, #tpu.memory_space<vmem>>, %arg12: memref<2x32x64xf32, #tpu.memory_space<vmem>>, %arg13: memref<2x1x64xf32, #tpu.memory_space<vmem>>, %arg14: memref<2x64x32xf32, #tpu.memory_space<vmem>>, %arg15: memref<2x1x32xf32, #tpu.memory_space<vmem>>, %arg16: memref<2x1x32xf32, #tpu.memory_space<vmem>>, %arg17: memref<2x1x32xf32, #tpu.memory_space<vmem>>, %arg18: memref<32x32xf32, #tpu.memory_space<vmem>>, %arg19: memref<1x32xf32, #tpu.memory_space<vmem>>, %arg20: memref<1x32xf32, #tpu.memory_space<vmem>>, %arg21: memref<1x32xf32, #tpu.memory_space<vmem>>, %arg22: memref<32x128xf32, #tpu.memory_space<vmem>>, %arg23: memref<1x128xf32, #tpu.memory_space<vmem>>, %arg24: memref<32x16xf32, #tpu.memory_space<vmem>>, %arg25: memref<1x16xf32, #tpu.memory_space<vmem>>, %arg26: memref<16x128xf32, #tpu.memory_space<vmem>>, %arg27: memref<1x128xf32, #tpu.memory_space<vmem>>, %arg28: memref<3x16x32xf32, #tpu.memory_space<vmem>>, %arg29: memref<16x32xf32, #tpu.memory_space<vmem>>, %arg30: memref<16x128xf32, #tpu.memory_space<vmem>>, %arg31: memref<16x128xf32, #tpu.memory_space<vmem>>) attributes {dimension_semantics = [], scalar_prefetch = 0 : i64, scratch_operands = 0 : i64, tpu.core_type = #tpu.core_type<tc>} {
    %c0 = arith.constant 0 : index
    %c0_0 = arith.constant 0 : index
    %0 = vector.load %arg0[%c0, %c0_0] : memref<16x1xi32, #tpu.memory_space<vmem>>, vector<16x1xi32>
    %1 = tpu.iota {dimensions = array<i32: 1>} : vector<16x64xi32>
    %2 = vector.broadcast %0 : vector<16x1xi32> to vector<16x64xi32>
    %3 = arith.cmpi eq, %1, %2 : vector<16x64xi32>
    %4 = arith.extui %3 : vector<16x64xi1> to vector<16x64xi32>
    %5 = arith.sitofp %4 : vector<16x64xi32> to vector<16x64xf32>
    %c0_1 = arith.constant 0 : index
    %c0_2 = arith.constant 0 : index
    %6 = vector.load %arg2[%c0_1, %c0_2] : memref<64x32xf32, #tpu.memory_space<vmem>>, vector<64x32xf32>
    %cst = arith.constant dense<0.000000e+00> : vector<16x32xf32>
    %7 = tpu.matmul %5, %6, %cst {dimension_numbers = #tpu.dot_dimension_numbers<[1], [0], [0], [1], [0, 0, 1, 1], [], []>} : vector<16x64xf32>, vector<64x32xf32>, vector<16x32xf32> -> vector<16x32xf32>
    %c0_3 = arith.constant 0 : index
    %c0_4 = arith.constant 0 : index
    %8 = vector.load %arg3[%c0_3, %c0_4] : memref<8x32xf32, #tpu.memory_space<vmem>>, vector<8x32xf32>
    %9 = tpu.concatenate %8, %8 in 0 : vector<8x32xf32>, vector<8x32xf32> -> vector<16x32xf32>
    %10 = arith.addf %7, %9 : vector<16x32xf32>
    %c0_5 = arith.constant 0 : index
    %c0_6 = arith.constant 0 : index
    %11 = vector.load %arg4[%c0_5, %c0_6] : memref<1x32xf32, #tpu.memory_space<vmem>>, vector<1x32xf32>
    %c0_7 = arith.constant 0 : index
    %c0_8 = arith.constant 0 : index
    %12 = vector.load %arg5[%c0_7, %c0_8] : memref<1x32xf32, #tpu.memory_space<vmem>>, vector<1x32xf32>
    %cst_9 = arith.constant dense<0.000000e+00> : vector<16xf32>
    %13 = vector.multi_reduction <add>, %10, %cst_9 [1] : vector<16x32xf32> to vector<16xf32>
    %14 = vector.shape_cast %13 : vector<16xf32> to vector<16x1xf32>
    %cst_10 = arith.constant 3.200000e+01 : f32
    %15 = vector.broadcast %cst_10 : f32 to vector<16x1xf32>
    %16 = arith.divf %14, %15 : vector<16x1xf32>
    %17 = vector.broadcast %16 : vector<16x1xf32> to vector<16x32xf32>
    %18 = arith.subf %10, %17 : vector<16x32xf32>
    %19 = arith.mulf %18, %18 : vector<16x32xf32>
    %cst_11 = arith.constant dense<0.000000e+00> : vector<16xf32>
    %20 = vector.multi_reduction <add>, %19, %cst_11 [1] : vector<16x32xf32> to vector<16xf32>
    %21 = vector.shape_cast %20 : vector<16xf32> to vector<16x1xf32>
    %cst_12 = arith.constant 3.200000e+01 : f32
    %22 = vector.broadcast %cst_12 : f32 to vector<16x1xf32>
    %23 = arith.divf %21, %22 : vector<16x1xf32>
    %24 = vector.broadcast %16 : vector<16x1xf32> to vector<16x32xf32>
    %25 = arith.subf %10, %24 : vector<16x32xf32>
    %cst_13 = arith.constant 9.99999996E-13 : f32
    %26 = vector.broadcast %cst_13 : f32 to vector<16x1xf32>
    %27 = arith.addf %23, %26 : vector<16x1xf32>
    %28 = math.rsqrt %27 : vector<16x1xf32>
    %29 = vector.broadcast %28 : vector<16x1xf32> to vector<16x32xf32>
    %30 = arith.mulf %25, %29 : vector<16x32xf32>
    %31 = vector.broadcast %11 : vector<1x32xf32> to vector<16x32xf32>
    %32 = arith.mulf %30, %31 : vector<16x32xf32>
    %33 = vector.broadcast %12 : vector<1x32xf32> to vector<16x32xf32>
    %34 = arith.addf %32, %33 : vector<16x32xf32>
    %c0_14 = arith.constant 0 : index
    %c0_15 = arith.constant 0 : index
    %c0_16 = arith.constant 0 : index
    %35 = vector.load %arg28[%c0_14, %c0_15, %c0_16] : memref<3x16x32xf32, #tpu.memory_space<vmem>>, vector<1x16x32xf32>
    %36 = vector.shape_cast %35 : vector<1x16x32xf32> to vector<16x32xf32>
    %37 = vector.shape_cast %34 : vector<16x32xf32> to vector<1x16x32xf32>
    tpu.vector_store %arg28[%c0_14, %c0_15, %c0_16], %37 {strides = array<i32>} : memref<3x16x32xf32, #tpu.memory_space<vmem>>, vector<1x16x32xf32>,
    %c0_17 = arith.constant 0 : index
    %c0_18 = arith.constant 0 : index
    %38 = vector.load %arg1[%c0_17, %c0_18] : memref<2x8xf32, #tpu.memory_space<vmem>>, vector<2x8xf32>
    %c0_19 = arith.constant 0 : index
    %c0_20 = arith.constant 0 : index
    %c0_21 = arith.constant 0 : index
    %39 = vector.load %arg6[%c0_19, %c0_20, %c0_21] : memref<2x32x96xf32, #tpu.memory_space<vmem>>, vector<1x32x96xf32>
    %40 = vector.shape_cast %39 : vector<1x32x96xf32> to vector<32x96xf32>
    %cst_22 = arith.constant dense<0.000000e+00> : vector<16x96xf32>
    %41 = tpu.matmul %34, %40, %cst_22 {dimension_numbers = #tpu.dot_dimension_numbers<[1], [0], [0], [1], [0, 0, 1, 1], [], []>} : vector<16x32xf32>, vector<32x96xf32>, vector<16x96xf32> -> vector<16x96xf32>
    %c0_23 = arith.constant 0 : index
    %c0_24 = arith.constant 0 : index
    %c0_25 = arith.constant 0 : index
    %42 = vector.load %arg7[%c0_23, %c0_24, %c0_25] : memref<2x1x96xf32, #tpu.memory_space<vmem>>, vector<1x1x96xf32>
    %43 = vector.shape_cast %42 : vector<1x1x96xf32> to vector<1x96xf32>
    %44 = vector.broadcast %43 : vector<1x96xf32> to vector<16x96xf32>
    %45 = arith.addf %41, %44 : vector<16x96xf32>
    %46 = vector.extract_strided_slice %45 {offsets = [0, 0], sizes = [16, 32], strides = [1, 1]} : vector<16x96xf32> to vector<16x32xf32>
    %47 = vector.extract_strided_slice %45 {offsets = [0, 32], sizes = [16, 32], strides = [1, 1]} : vector<16x96xf32> to vector<16x32xf32>
    %48 = vector.extract_strided_slice %45 {offsets = [0, 64], sizes = [16, 32], strides = [1, 1]} : vector<16x96xf32> to vector<16x32xf32>
    %49 = vector.extract_strided_slice %46 {offsets = [0, 0], sizes = [8, 32], strides = [1, 1]} : vector<16x32xf32> to vector<8x32xf32>
    %50 = vector.extract_strided_slice %47 {offsets = [0, 0], sizes = [8, 32], strides = [1, 1]} : vector<16x32xf32> to vector<8x32xf32>
    %51 = vector.extract_strided_slice %48 {offsets = [0, 0], sizes = [8, 32], strides = [1, 1]} : vector<16x32xf32> to vector<8x32xf32>
    %52 = vector.extract_strided_slice %38 {offsets = [0, 0], sizes = [1, 8], strides = [1, 1]} : vector<2x8xf32> to vector<1x8xf32>
    %53 = vector.extract_strided_slice %49 {offsets = [0, 0], sizes = [8, 16], strides = [1, 1]} : vector<8x32xf32> to vector<8x16xf32>
    %54 = vector.extract_strided_slice %50 {offsets = [0, 0], sizes = [8, 16], strides = [1, 1]} : vector<8x32xf32> to vector<8x16xf32>
    %55 = vector.extract_strided_slice %51 {offsets = [0, 0], sizes = [8, 16], strides = [1, 1]} : vector<8x32xf32> to vector<8x16xf32>
    %cst_26 = arith.constant dense<0.000000e+00> : vector<8x8xf32>
    %56 = tpu.matmul %53, %54, %cst_26 {dimension_numbers = #tpu.dot_dimension_numbers<[1], [1], [0], [0], [0, 0, 1, 0], [], []>} : vector<8x16xf32>, vector<8x16xf32>, vector<8x8xf32> -> vector<8x8xf32>
    %cst_27 = arith.constant 2.500000e-01 : f32
    %57 = vector.broadcast %cst_27 : f32 to vector<8x8xf32>
    %58 = arith.mulf %56, %57 : vector<8x8xf32>
    %59 = vector.broadcast %52 : vector<1x8xf32> to vector<8x8xf32>
    %60 = arith.addf %58, %59 : vector<8x8xf32>
    %cst_28 = arith.constant dense<0xFF800000> : vector<8xf32>
    %61 = vector.multi_reduction <maximumf>, %60, %cst_28 [1] : vector<8x8xf32> to vector<8xf32>
    %62 = vector.shape_cast %61 : vector<8xf32> to vector<8x1xf32>
    %63 = vector.broadcast %62 : vector<8x1xf32> to vector<8x8xf32>
    %64 = arith.subf %60, %63 : vector<8x8xf32>
    %65 = math.exp %64 : vector<8x8xf32>
    %cst_29 = arith.constant dense<0.000000e+00> : vector<8xf32>
    %66 = vector.multi_reduction <add>, %65, %cst_29 [1] : vector<8x8xf32> to vector<8xf32>
    %67 = vector.shape_cast %66 : vector<8xf32> to vector<8x1xf32>
    %68 = vector.broadcast %67 : vector<8x1xf32> to vector<8x8xf32>
    %69 = arith.divf %65, %68 : vector<8x8xf32>
    %cst_30 = arith.constant dense<0.000000e+00> : vector<8x16xf32>
    %70 = tpu.matmul %69, %55, %cst_30 {dimension_numbers = #tpu.dot_dimension_numbers<[1], [0], [0], [1], [0, 0, 1, 1], [], []>} : vector<8x8xf32>, vector<8x16xf32>, vector<8x16xf32> -> vector<8x16xf32>
    %71 = vector.extract_strided_slice %49 {offsets = [0, 16], sizes = [8, 16], strides = [1, 1]} : vector<8x32xf32> to vector<8x16xf32>
    %72 = vector.extract_strided_slice %50 {offsets = [0, 16], sizes = [8, 16], strides = [1, 1]} : vector<8x32xf32> to vector<8x16xf32>
    %73 = vector.extract_strided_slice %51 {offsets = [0, 16], sizes = [8, 16], strides = [1, 1]} : vector<8x32xf32> to vector<8x16xf32>
    %cst_31 = arith.constant dense<0.000000e+00> : vector<8x8xf32>
    %74 = tpu.matmul %71, %72, %cst_31 {dimension_numbers = #tpu.dot_dimension_numbers<[1], [1], [0], [0], [0, 0, 1, 0], [], []>} : vector<8x16xf32>, vector<8x16xf32>, vector<8x8xf32> -> vector<8x8xf32>
    %cst_32 = arith.constant 2.500000e-01 : f32
    %75 = vector.broadcast %cst_32 : f32 to vector<8x8xf32>
    %76 = arith.mulf %74, %75 : vector<8x8xf32>
    %77 = vector.broadcast %52 : vector<1x8xf32> to vector<8x8xf32>
    %78 = arith.addf %76, %77 : vector<8x8xf32>
    %cst_33 = arith.constant dense<0xFF800000> : vector<8xf32>
    %79 = vector.multi_reduction <maximumf>, %78, %cst_33 [1] : vector<8x8xf32> to vector<8xf32>
    %80 = vector.shape_cast %79 : vector<8xf32> to vector<8x1xf32>
    %81 = vector.broadcast %80 : vector<8x1xf32> to vector<8x8xf32>
    %82 = arith.subf %78, %81 : vector<8x8xf32>
    %83 = math.exp %82 : vector<8x8xf32>
    %cst_34 = arith.constant dense<0.000000e+00> : vector<8xf32>
    %84 = vector.multi_reduction <add>, %83, %cst_34 [1] : vector<8x8xf32> to vector<8xf32>
    %85 = vector.shape_cast %84 : vector<8xf32> to vector<8x1xf32>
    %86 = vector.broadcast %85 : vector<8x1xf32> to vector<8x8xf32>
    %87 = arith.divf %83, %86 : vector<8x8xf32>
    %cst_35 = arith.constant dense<0.000000e+00> : vector<8x16xf32>
    %88 = tpu.matmul %87, %73, %cst_35 {dimension_numbers = #tpu.dot_dimension_numbers<[1], [0], [0], [1], [0, 0, 1, 1], [], []>} : vector<8x8xf32>, vector<8x16xf32>, vector<8x16xf32> -> vector<8x16xf32>
    %89 = tpu.concatenate %70, %88 in 1 : vector<8x16xf32>, vector<8x16xf32> -> vector<8x32xf32>
    %90 = vector.extract_strided_slice %46 {offsets = [8, 0], sizes = [8, 32], strides = [1, 1]} : vector<16x32xf32> to vector<8x32xf32>
    %91 = vector.extract_strided_slice %47 {offsets = [8, 0], sizes = [8, 32], strides = [1, 1]} : vector<16x32xf32> to vector<8x32xf32>
    %92 = vector.extract_strided_slice %48 {offsets = [8, 0], sizes = [8, 32], strides = [1, 1]} : vector<16x32xf32> to vector<8x32xf32>
    %93 = vector.extract_strided_slice %38 {offsets = [1, 0], sizes = [1, 8], strides = [1, 1]} : vector<2x8xf32> to vector<1x8xf32>
    %94 = vector.extract_strided_slice %90 {offsets = [0, 0], sizes = [8, 16], strides = [1, 1]} : vector<8x32xf32> to vector<8x16xf32>
    %95 = vector.extract_strided_slice %91 {offsets = [0, 0], sizes = [8, 16], strides = [1, 1]} : vector<8x32xf32> to vector<8x16xf32>
    %96 = vector.extract_strided_slice %92 {offsets = [0, 0], sizes = [8, 16], strides = [1, 1]} : vector<8x32xf32> to vector<8x16xf32>
    %cst_36 = arith.constant dense<0.000000e+00> : vector<8x8xf32>
    %97 = tpu.matmul %94, %95, %cst_36 {dimension_numbers = #tpu.dot_dimension_numbers<[1], [1], [0], [0], [0, 0, 1, 0], [], []>} : vector<8x16xf32>, vector<8x16xf32>, vector<8x8xf32> -> vector<8x8xf32>
    %cst_37 = arith.constant 2.500000e-01 : f32
    %98 = vector.broadcast %cst_37 : f32 to vector<8x8xf32>
    %99 = arith.mulf %97, %98 : vector<8x8xf32>
    %100 = vector.broadcast %93 : vector<1x8xf32> to vector<8x8xf32>
    %101 = arith.addf %99, %100 : vector<8x8xf32>
    %cst_38 = arith.constant dense<0xFF800000> : vector<8xf32>
    %102 = vector.multi_reduction <maximumf>, %101, %cst_38 [1] : vector<8x8xf32> to vector<8xf32>
    %103 = vector.shape_cast %102 : vector<8xf32> to vector<8x1xf32>
    %104 = vector.broadcast %103 : vector<8x1xf32> to vector<8x8xf32>
    %105 = arith.subf %101, %104 : vector<8x8xf32>
    %106 = math.exp %105 : vector<8x8xf32>
    %cst_39 = arith.constant dense<0.000000e+00> : vector<8xf32>
    %107 = vector.multi_reduction <add>, %106, %cst_39 [1] : vector<8x8xf32> to vector<8xf32>
    %108 = vector.shape_cast %107 : vector<8xf32> to vector<8x1xf32>
    %109 = vector.broadcast %108 : vector<8x1xf32> to vector<8x8xf32>
    %110 = arith.divf %106, %109 : vector<8x8xf32>
    %cst_40 = arith.constant dense<0.000000e+00> : vector<8x16xf32>
    %111 = tpu.matmul %110, %96, %cst_40 {dimension_numbers = #tpu.dot_dimension_numbers<[1], [0], [0], [1], [0, 0, 1, 1], [], []>} : vector<8x8xf32>, vector<8x16xf32>, vector<8x16xf32> -> vector<8x16xf32>
    %112 = vector.extract_strided_slice %90 {offsets = [0, 16], sizes = [8, 16], strides = [1, 1]} : vector<8x32xf32> to vector<8x16xf32>
    %113 = vector.extract_strided_slice %91 {offsets = [0, 16], sizes = [8, 16], strides = [1, 1]} : vector<8x32xf32> to vector<8x16xf32>
    %114 = vector.extract_strided_slice %92 {offsets = [0, 16], sizes = [8, 16], strides = [1, 1]} : vector<8x32xf32> to vector<8x16xf32>
    %cst_41 = arith.constant dense<0.000000e+00> : vector<8x8xf32>
    %115 = tpu.matmul %112, %113, %cst_41 {dimension_numbers = #tpu.dot_dimension_numbers<[1], [1], [0], [0], [0, 0, 1, 0], [], []>} : vector<8x16xf32>, vector<8x16xf32>, vector<8x8xf32> -> vector<8x8xf32>
    %cst_42 = arith.constant 2.500000e-01 : f32
    %116 = vector.broadcast %cst_42 : f32 to vector<8x8xf32>
    %117 = arith.mulf %115, %116 : vector<8x8xf32>
    %118 = vector.broadcast %93 : vector<1x8xf32> to vector<8x8xf32>
    %119 = arith.addf %117, %118 : vector<8x8xf32>
    %cst_43 = arith.constant dense<0xFF800000> : vector<8xf32>
    %120 = vector.multi_reduction <maximumf>, %119, %cst_43 [1] : vector<8x8xf32> to vector<8xf32>
    %121 = vector.shape_cast %120 : vector<8xf32> to vector<8x1xf32>
    %122 = vector.broadcast %121 : vector<8x1xf32> to vector<8x8xf32>
    %123 = arith.subf %119, %122 : vector<8x8xf32>
    %124 = math.exp %123 : vector<8x8xf32>
    %cst_44 = arith.constant dense<0.000000e+00> : vector<8xf32>
    %125 = vector.multi_reduction <add>, %124, %cst_44 [1] : vector<8x8xf32> to vector<8xf32>
    %126 = vector.shape_cast %125 : vector<8xf32> to vector<8x1xf32>
    %127 = vector.broadcast %126 : vector<8x1xf32> to vector<8x8xf32>
    %128 = arith.divf %124, %127 : vector<8x8xf32>
    %cst_45 = arith.constant dense<0.000000e+00> : vector<8x16xf32>
    %129 = tpu.matmul %128, %114, %cst_45 {dimension_numbers = #tpu.dot_dimension_numbers<[1], [0], [0], [1], [0, 0, 1, 1], [], []>} : vector<8x8xf32>, vector<8x16xf32>, vector<8x16xf32> -> vector<8x16xf32>
    %130 = tpu.concatenate %111, %129 in 1 : vector<8x16xf32>, vector<8x16xf32> -> vector<8x32xf32>
    %131 = tpu.concatenate %89, %130 in 0 : vector<8x32xf32>, vector<8x32xf32> -> vector<16x32xf32>
    %c0_46 = arith.constant 0 : index
    %c0_47 = arith.constant 0 : index
    %c0_48 = arith.constant 0 : index
    %132 = vector.load %arg8[%c0_46, %c0_47, %c0_48] : memref<2x32x32xf32, #tpu.memory_space<vmem>>, vector<1x32x32xf32>
    %133 = vector.shape_cast %132 : vector<1x32x32xf32> to vector<32x32xf32>
    %cst_49 = arith.constant dense<0.000000e+00> : vector<16x32xf32>
    %134 = tpu.matmul %131, %133, %cst_49 {dimension_numbers = #tpu.dot_dimension_numbers<[1], [0], [0], [1], [0, 0, 1, 1], [], []>} : vector<16x32xf32>, vector<32x32xf32>, vector<16x32xf32> -> vector<16x32xf32>
    %c0_50 = arith.constant 0 : index
    %c0_51 = arith.constant 0 : index
    %c0_52 = arith.constant 0 : index
    %135 = vector.load %arg9[%c0_50, %c0_51, %c0_52] : memref<2x1x32xf32, #tpu.memory_space<vmem>>, vector<1x1x32xf32>
    %136 = vector.shape_cast %135 : vector<1x1x32xf32> to vector<1x32xf32>
    %137 = vector.broadcast %136 : vector<1x32xf32> to vector<16x32xf32>
    %138 = arith.addf %134, %137 : vector<16x32xf32>
    %139 = arith.addf %34, %138 : vector<16x32xf32>
    %c0_53 = arith.constant 0 : index
    %c0_54 = arith.constant 0 : index
    %c0_55 = arith.constant 0 : index
    %140 = vector.load %arg10[%c0_53, %c0_54, %c0_55] : memref<2x1x32xf32, #tpu.memory_space<vmem>>, vector<1x1x32xf32>
    %141 = vector.shape_cast %140 : vector<1x1x32xf32> to vector<1x32xf32>
    %c0_56 = arith.constant 0 : index
    %c0_57 = arith.constant 0 : index
    %c0_58 = arith.constant 0 : index
    %142 = vector.load %arg11[%c0_56, %c0_57, %c0_58] : memref<2x1x32xf32, #tpu.memory_space<vmem>>, vector<1x1x32xf32>
    %143 = vector.shape_cast %142 : vector<1x1x32xf32> to vector<1x32xf32>
    %cst_59 = arith.constant dense<0.000000e+00> : vector<16xf32>
    %144 = vector.multi_reduction <add>, %139, %cst_59 [1] : vector<16x32xf32> to vector<16xf32>
    %145 = vector.shape_cast %144 : vector<16xf32> to vector<16x1xf32>
    %cst_60 = arith.constant 3.200000e+01 : f32
    %146 = vector.broadcast %cst_60 : f32 to vector<16x1xf32>
    %147 = arith.divf %145, %146 : vector<16x1xf32>
    %148 = vector.broadcast %147 : vector<16x1xf32> to vector<16x32xf32>
    %149 = arith.subf %139, %148 : vector<16x32xf32>
    %150 = arith.mulf %149, %149 : vector<16x32xf32>
    %cst_61 = arith.constant dense<0.000000e+00> : vector<16xf32>
    %151 = vector.multi_reduction <add>, %150, %cst_61 [1] : vector<16x32xf32> to vector<16xf32>
    %152 = vector.shape_cast %151 : vector<16xf32> to vector<16x1xf32>
    %cst_62 = arith.constant 3.200000e+01 : f32
    %153 = vector.broadcast %cst_62 : f32 to vector<16x1xf32>
    %154 = arith.divf %152, %153 : vector<16x1xf32>
    %155 = vector.broadcast %147 : vector<16x1xf32> to vector<16x32xf32>
    %156 = arith.subf %139, %155 : vector<16x32xf32>
    %cst_63 = arith.constant 9.99999996E-13 : f32
    %157 = vector.broadcast %cst_63 : f32 to vector<16x1xf32>
    %158 = arith.addf %154, %157 : vector<16x1xf32>
    %159 = math.rsqrt %158 : vector<16x1xf32>
    %160 = vector.broadcast %159 : vector<16x1xf32> to vector<16x32xf32>
    %161 = arith.mulf %156, %160 : vector<16x32xf32>
    %162 = vector.broadcast %141 : vector<1x32xf32> to vector<16x32xf32>
    %163 = arith.mulf %161, %162 : vector<16x32xf32>
    %164 = vector.broadcast %143 : vector<1x32xf32> to vector<16x32xf32>
    %165 = arith.addf %163, %164 : vector<16x32xf32>
    %c0_64 = arith.constant 0 : index
    %c0_65 = arith.constant 0 : index
    %c0_66 = arith.constant 0 : index
    %166 = vector.load %arg12[%c0_64, %c0_65, %c0_66] : memref<2x32x64xf32, #tpu.memory_space<vmem>>, vector<1x32x64xf32>
    %167 = vector.shape_cast %166 : vector<1x32x64xf32> to vector<32x64xf32>
    %cst_67 = arith.constant dense<0.000000e+00> : vector<16x64xf32>
    %168 = tpu.matmul %165, %167, %cst_67 {dimension_numbers = #tpu.dot_dimension_numbers<[1], [0], [0], [1], [0, 0, 1, 1], [], []>} : vector<16x32xf32>, vector<32x64xf32>, vector<16x64xf32> -> vector<16x64xf32>
    %c0_68 = arith.constant 0 : index
    %c0_69 = arith.constant 0 : index
    %c0_70 = arith.constant 0 : index
    %169 = vector.load %arg13[%c0_68, %c0_69, %c0_70] : memref<2x1x64xf32, #tpu.memory_space<vmem>>, vector<1x1x64xf32>
    %170 = vector.shape_cast %169 : vector<1x1x64xf32> to vector<1x64xf32>
    %171 = vector.broadcast %170 : vector<1x64xf32> to vector<16x64xf32>
    %172 = arith.addf %168, %171 : vector<16x64xf32>
    %cst_71 = arith.constant 5.000000e-01 : f32
    %173 = vector.broadcast %cst_71 : f32 to vector<16x64xf32>
    %174 = arith.mulf %173, %172 : vector<16x64xf32>
    %cst_72 = arith.constant 0.707106769 : f32
    %175 = vector.broadcast %cst_72 : f32 to vector<16x64xf32>
    %176 = arith.mulf %172, %175 : vector<16x64xf32>
    %177 = math.erf %176 : vector<16x64xf32>
    %cst_73 = arith.constant 1.000000e+00 : f32
    %178 = vector.broadcast %cst_73 : f32 to vector<16x64xf32>
    %179 = arith.addf %178, %177 : vector<16x64xf32>
    %180 = arith.mulf %174, %179 : vector<16x64xf32>
    %c0_74 = arith.constant 0 : index
    %c0_75 = arith.constant 0 : index
    %c0_76 = arith.constant 0 : index
    %181 = vector.load %arg14[%c0_74, %c0_75, %c0_76] : memref<2x64x32xf32, #tpu.memory_space<vmem>>, vector<1x64x32xf32>
    %182 = vector.shape_cast %181 : vector<1x64x32xf32> to vector<64x32xf32>
    %cst_77 = arith.constant dense<0.000000e+00> : vector<16x32xf32>
    %183 = tpu.matmul %180, %182, %cst_77 {dimension_numbers = #tpu.dot_dimension_numbers<[1], [0], [0], [1], [0, 0, 1, 1], [], []>} : vector<16x64xf32>, vector<64x32xf32>, vector<16x32xf32> -> vector<16x32xf32>
    %c0_78 = arith.constant 0 : index
    %c0_79 = arith.constant 0 : index
    %c0_80 = arith.constant 0 : index
    %184 = vector.load %arg15[%c0_78, %c0_79, %c0_80] : memref<2x1x32xf32, #tpu.memory_space<vmem>>, vector<1x1x32xf32>
    %185 = vector.shape_cast %184 : vector<1x1x32xf32> to vector<1x32xf32>
    %186 = vector.broadcast %185 : vector<1x32xf32> to vector<16x32xf32>
    %187 = arith.addf %183, %186 : vector<16x32xf32>
    %188 = arith.addf %165, %187 : vector<16x32xf32>
    %c0_81 = arith.constant 0 : index
    %c0_82 = arith.constant 0 : index
    %c0_83 = arith.constant 0 : index
    %189 = vector.load %arg16[%c0_81, %c0_82, %c0_83] : memref<2x1x32xf32, #tpu.memory_space<vmem>>, vector<1x1x32xf32>
    %190 = vector.shape_cast %189 : vector<1x1x32xf32> to vector<1x32xf32>
    %c0_84 = arith.constant 0 : index
    %c0_85 = arith.constant 0 : index
    %c0_86 = arith.constant 0 : index
    %191 = vector.load %arg17[%c0_84, %c0_85, %c0_86] : memref<2x1x32xf32, #tpu.memory_space<vmem>>, vector<1x1x32xf32>
    %192 = vector.shape_cast %191 : vector<1x1x32xf32> to vector<1x32xf32>
    %cst_87 = arith.constant dense<0.000000e+00> : vector<16xf32>
    %193 = vector.multi_reduction <add>, %188, %cst_87 [1] : vector<16x32xf32> to vector<16xf32>
    %194 = vector.shape_cast %193 : vector<16xf32> to vector<16x1xf32>
    %cst_88 = arith.constant 3.200000e+01 : f32
    %195 = vector.broadcast %cst_88 : f32 to vector<16x1xf32>
    %196 = arith.divf %194, %195 : vector<16x1xf32>
    %197 = vector.broadcast %196 : vector<16x1xf32> to vector<16x32xf32>
    %198 = arith.subf %188, %197 : vector<16x32xf32>
    %199 = arith.mulf %198, %198 : vector<16x32xf32>
    %cst_89 = arith.constant dense<0.000000e+00> : vector<16xf32>
    %200 = vector.multi_reduction <add>, %199, %cst_89 [1] : vector<16x32xf32> to vector<16xf32>
    %201 = vector.shape_cast %200 : vector<16xf32> to vector<16x1xf32>
    %cst_90 = arith.constant 3.200000e+01 : f32
    %202 = vector.broadcast %cst_90 : f32 to vector<16x1xf32>
    %203 = arith.divf %201, %202 : vector<16x1xf32>
    %204 = vector.broadcast %196 : vector<16x1xf32> to vector<16x32xf32>
    %205 = arith.subf %188, %204 : vector<16x32xf32>
    %cst_91 = arith.constant 9.99999996E-13 : f32
    %206 = vector.broadcast %cst_91 : f32 to vector<16x1xf32>
    %207 = arith.addf %203, %206 : vector<16x1xf32>
    %208 = math.rsqrt %207 : vector<16x1xf32>
    %209 = vector.broadcast %208 : vector<16x1xf32> to vector<16x32xf32>
    %210 = arith.mulf %205, %209 : vector<16x32xf32>
    %211 = vector.broadcast %190 : vector<1x32xf32> to vector<16x32xf32>
    %212 = arith.mulf %210, %211 : vector<16x32xf32>
    %213 = vector.broadcast %192 : vector<1x32xf32> to vector<16x32xf32>
    %214 = arith.addf %212, %213 : vector<16x32xf32>
    %c1 = arith.constant 1 : index
    %c0_92 = arith.constant 0 : index
    %c0_93 = arith.constant 0 : index
    %215 = vector.load %arg28[%c1, %c0_92, %c0_93] : memref<3x16x32xf32, #tpu.memory_space<vmem>>, vector<1x16x32xf32>
    %216 = vector.shape_cast %215 : vector<1x16x32xf32> to vector<16x32xf32>
    %217 = vector.shape_cast %214 : vector<16x32xf32> to vector<1x16x32xf32>
    tpu.vector_store %arg28[%c1, %c0_92, %c0_93], %217 {strides = array<i32>} : memref<3x16x32xf32, #tpu.memory_space<vmem>>, vector<1x16x32xf32>,
    %c1_94 = arith.constant 1 : index
    %c0_95 = arith.constant 0 : index
    %c0_96 = arith.constant 0 : index
    %218 = vector.load %arg6[%c1_94, %c0_95, %c0_96] : memref<2x32x96xf32, #tpu.memory_space<vmem>>, vector<1x32x96xf32>
    %219 = vector.shape_cast %218 : vector<1x32x96xf32> to vector<32x96xf32>
    %cst_97 = arith.constant dense<0.000000e+00> : vector<16x96xf32>
    %220 = tpu.matmul %214, %219, %cst_97 {dimension_numbers = #tpu.dot_dimension_numbers<[1], [0], [0], [1], [0, 0, 1, 1], [], []>} : vector<16x32xf32>, vector<32x96xf32>, vector<16x96xf32> -> vector<16x96xf32>
    %c1_98 = arith.constant 1 : index
    %c0_99 = arith.constant 0 : index
    %c0_100 = arith.constant 0 : index
    %221 = vector.load %arg7[%c1_98, %c0_99, %c0_100] : memref<2x1x96xf32, #tpu.memory_space<vmem>>, vector<1x1x96xf32>
    %222 = vector.shape_cast %221 : vector<1x1x96xf32> to vector<1x96xf32>
    %223 = vector.broadcast %222 : vector<1x96xf32> to vector<16x96xf32>
    %224 = arith.addf %220, %223 : vector<16x96xf32>
    %225 = vector.extract_strided_slice %224 {offsets = [0, 0], sizes = [16, 32], strides = [1, 1]} : vector<16x96xf32> to vector<16x32xf32>
    %226 = vector.extract_strided_slice %224 {offsets = [0, 32], sizes = [16, 32], strides = [1, 1]} : vector<16x96xf32> to vector<16x32xf32>
    %227 = vector.extract_strided_slice %224 {offsets = [0, 64], sizes = [16, 32], strides = [1, 1]} : vector<16x96xf32> to vector<16x32xf32>
    %228 = vector.extract_strided_slice %225 {offsets = [0, 0], sizes = [8, 32], strides = [1, 1]} : vector<16x32xf32> to vector<8x32xf32>
    %229 = vector.extract_strided_slice %226 {offsets = [0, 0], sizes = [8, 32], strides = [1, 1]} : vector<16x32xf32> to vector<8x32xf32>
    %230 = vector.extract_strided_slice %227 {offsets = [0, 0], sizes = [8, 32], strides = [1, 1]} : vector<16x32xf32> to vector<8x32xf32>
    %231 = vector.extract_strided_slice %38 {offsets = [0, 0], sizes = [1, 8], strides = [1, 1]} : vector<2x8xf32> to vector<1x8xf32>
    %232 = vector.extract_strided_slice %228 {offsets = [0, 0], sizes = [8, 16], strides = [1, 1]} : vector<8x32xf32> to vector<8x16xf32>
    %233 = vector.extract_strided_slice %229 {offsets = [0, 0], sizes = [8, 16], strides = [1, 1]} : vector<8x32xf32> to vector<8x16xf32>
    %234 = vector.extract_strided_slice %230 {offsets = [0, 0], sizes = [8, 16], strides = [1, 1]} : vector<8x32xf32> to vector<8x16xf32>
    %cst_101 = arith.constant dense<0.000000e+00> : vector<8x8xf32>
    %235 = tpu.matmul %232, %233, %cst_101 {dimension_numbers = #tpu.dot_dimension_numbers<[1], [1], [0], [0], [0, 0, 1, 0], [], []>} : vector<8x16xf32>, vector<8x16xf32>, vector<8x8xf32> -> vector<8x8xf32>
    %cst_102 = arith.constant 2.500000e-01 : f32
    %236 = vector.broadcast %cst_102 : f32 to vector<8x8xf32>
    %237 = arith.mulf %235, %236 : vector<8x8xf32>
    %238 = vector.broadcast %231 : vector<1x8xf32> to vector<8x8xf32>
    %239 = arith.addf %237, %238 : vector<8x8xf32>
    %cst_103 = arith.constant dense<0xFF800000> : vector<8xf32>
    %240 = vector.multi_reduction <maximumf>, %239, %cst_103 [1] : vector<8x8xf32> to vector<8xf32>
    %241 = vector.shape_cast %240 : vector<8xf32> to vector<8x1xf32>
    %242 = vector.broadcast %241 : vector<8x1xf32> to vector<8x8xf32>
    %243 = arith.subf %239, %242 : vector<8x8xf32>
    %244 = math.exp %243 : vector<8x8xf32>
    %cst_104 = arith.constant dense<0.000000e+00> : vector<8xf32>
    %245 = vector.multi_reduction <add>, %244, %cst_104 [1] : vector<8x8xf32> to vector<8xf32>
    %246 = vector.shape_cast %245 : vector<8xf32> to vector<8x1xf32>
    %247 = vector.broadcast %246 : vector<8x1xf32> to vector<8x8xf32>
    %248 = arith.divf %244, %247 : vector<8x8xf32>
    %cst_105 = arith.constant dense<0.000000e+00> : vector<8x16xf32>
    %249 = tpu.matmul %248, %234, %cst_105 {dimension_numbers = #tpu.dot_dimension_numbers<[1], [0], [0], [1], [0, 0, 1, 1], [], []>} : vector<8x8xf32>, vector<8x16xf32>, vector<8x16xf32> -> vector<8x16xf32>
    %250 = vector.extract_strided_slice %228 {offsets = [0, 16], sizes = [8, 16], strides = [1, 1]} : vector<8x32xf32> to vector<8x16xf32>
    %251 = vector.extract_strided_slice %229 {offsets = [0, 16], sizes = [8, 16], strides = [1, 1]} : vector<8x32xf32> to vector<8x16xf32>
    %252 = vector.extract_strided_slice %230 {offsets = [0, 16], sizes = [8, 16], strides = [1, 1]} : vector<8x32xf32> to vector<8x16xf32>
    %cst_106 = arith.constant dense<0.000000e+00> : vector<8x8xf32>
    %253 = tpu.matmul %250, %251, %cst_106 {dimension_numbers = #tpu.dot_dimension_numbers<[1], [1], [0], [0], [0, 0, 1, 0], [], []>} : vector<8x16xf32>, vector<8x16xf32>, vector<8x8xf32> -> vector<8x8xf32>
    %cst_107 = arith.constant 2.500000e-01 : f32
    %254 = vector.broadcast %cst_107 : f32 to vector<8x8xf32>
    %255 = arith.mulf %253, %254 : vector<8x8xf32>
    %256 = vector.broadcast %231 : vector<1x8xf32> to vector<8x8xf32>
    %257 = arith.addf %255, %256 : vector<8x8xf32>
    %cst_108 = arith.constant dense<0xFF800000> : vector<8xf32>
    %258 = vector.multi_reduction <maximumf>, %257, %cst_108 [1] : vector<8x8xf32> to vector<8xf32>
    %259 = vector.shape_cast %258 : vector<8xf32> to vector<8x1xf32>
    %260 = vector.broadcast %259 : vector<8x1xf32> to vector<8x8xf32>
    %261 = arith.subf %257, %260 : vector<8x8xf32>
    %262 = math.exp %261 : vector<8x8xf32>
    %cst_109 = arith.constant dense<0.000000e+00> : vector<8xf32>
    %263 = vector.multi_reduction <add>, %262, %cst_109 [1] : vector<8x8xf32> to vector<8xf32>
    %264 = vector.shape_cast %263 : vector<8xf32> to vector<8x1xf32>
    %265 = vector.broadcast %264 : vector<8x1xf32> to vector<8x8xf32>
    %266 = arith.divf %262, %265 : vector<8x8xf32>
    %cst_110 = arith.constant dense<0.000000e+00> : vector<8x16xf32>
    %267 = tpu.matmul %266, %252, %cst_110 {dimension_numbers = #tpu.dot_dimension_numbers<[1], [0], [0], [1], [0, 0, 1, 1], [], []>} : vector<8x8xf32>, vector<8x16xf32>, vector<8x16xf32> -> vector<8x16xf32>
    %268 = tpu.concatenate %249, %267 in 1 : vector<8x16xf32>, vector<8x16xf32> -> vector<8x32xf32>
    %269 = vector.extract_strided_slice %225 {offsets = [8, 0], sizes = [8, 32], strides = [1, 1]} : vector<16x32xf32> to vector<8x32xf32>
    %270 = vector.extract_strided_slice %226 {offsets = [8, 0], sizes = [8, 32], strides = [1, 1]} : vector<16x32xf32> to vector<8x32xf32>
    %271 = vector.extract_strided_slice %227 {offsets = [8, 0], sizes = [8, 32], strides = [1, 1]} : vector<16x32xf32> to vector<8x32xf32>
    %272 = vector.extract_strided_slice %38 {offsets = [1, 0], sizes = [1, 8], strides = [1, 1]} : vector<2x8xf32> to vector<1x8xf32>
    %273 = vector.extract_strided_slice %269 {offsets = [0, 0], sizes = [8, 16], strides = [1, 1]} : vector<8x32xf32> to vector<8x16xf32>
    %274 = vector.extract_strided_slice %270 {offsets = [0, 0], sizes = [8, 16], strides = [1, 1]} : vector<8x32xf32> to vector<8x16xf32>
    %275 = vector.extract_strided_slice %271 {offsets = [0, 0], sizes = [8, 16], strides = [1, 1]} : vector<8x32xf32> to vector<8x16xf32>
    %cst_111 = arith.constant dense<0.000000e+00> : vector<8x8xf32>
    %276 = tpu.matmul %273, %274, %cst_111 {dimension_numbers = #tpu.dot_dimension_numbers<[1], [1], [0], [0], [0, 0, 1, 0], [], []>} : vector<8x16xf32>, vector<8x16xf32>, vector<8x8xf32> -> vector<8x8xf32>
    %cst_112 = arith.constant 2.500000e-01 : f32
    %277 = vector.broadcast %cst_112 : f32 to vector<8x8xf32>
    %278 = arith.mulf %276, %277 : vector<8x8xf32>
    %279 = vector.broadcast %272 : vector<1x8xf32> to vector<8x8xf32>
    %280 = arith.addf %278, %279 : vector<8x8xf32>
    %cst_113 = arith.constant dense<0xFF800000> : vector<8xf32>
    %281 = vector.multi_reduction <maximumf>, %280, %cst_113 [1] : vector<8x8xf32> to vector<8xf32>
    %282 = vector.shape_cast %281 : vector<8xf32> to vector<8x1xf32>
    %283 = vector.broadcast %282 : vector<8x1xf32> to vector<8x8xf32>
    %284 = arith.subf %280, %283 : vector<8x8xf32>
    %285 = math.exp %284 : vector<8x8xf32>
    %cst_114 = arith.constant dense<0.000000e+00> : vector<8xf32>
    %286 = vector.multi_reduction <add>, %285, %cst_114 [1] : vector<8x8xf32> to vector<8xf32>
    %287 = vector.shape_cast %286 : vector<8xf32> to vector<8x1xf32>
    %288 = vector.broadcast %287 : vector<8x1xf32> to vector<8x8xf32>
    %289 = arith.divf %285, %288 : vector<8x8xf32>
    %cst_115 = arith.constant dense<0.000000e+00> : vector<8x16xf32>
    %290 = tpu.matmul %289, %275, %cst_115 {dimension_numbers = #tpu.dot_dimension_numbers<[1], [0], [0], [1], [0, 0, 1, 1], [], []>} : vector<8x8xf32>, vector<8x16xf32>, vector<8x16xf32> -> vector<8x16xf32>
    %291 = vector.extract_strided_slice %269 {offsets = [0, 16], sizes = [8, 16], strides = [1, 1]} : vector<8x32xf32> to vector<8x16xf32>
    %292 = vector.extract_strided_slice %270 {offsets = [0, 16], sizes = [8, 16], strides = [1, 1]} : vector<8x32xf32> to vector<8x16xf32>
    %293 = vector.extract_strided_slice %271 {offsets = [0, 16], sizes = [8, 16], strides = [1, 1]} : vector<8x32xf32> to vector<8x16xf32>
    %cst_116 = arith.constant dense<0.000000e+00> : vector<8x8xf32>
    %294 = tpu.matmul %291, %292, %cst_116 {dimension_numbers = #tpu.dot_dimension_numbers<[1], [1], [0], [0], [0, 0, 1, 0], [], []>} : vector<8x16xf32>, vector<8x16xf32>, vector<8x8xf32> -> vector<8x8xf32>
    %cst_117 = arith.constant 2.500000e-01 : f32
    %295 = vector.broadcast %cst_117 : f32 to vector<8x8xf32>
    %296 = arith.mulf %294, %295 : vector<8x8xf32>
    %297 = vector.broadcast %272 : vector<1x8xf32> to vector<8x8xf32>
    %298 = arith.addf %296, %297 : vector<8x8xf32>
    %cst_118 = arith.constant dense<0xFF800000> : vector<8xf32>
    %299 = vector.multi_reduction <maximumf>, %298, %cst_118 [1] : vector<8x8xf32> to vector<8xf32>
    %300 = vector.shape_cast %299 : vector<8xf32> to vector<8x1xf32>
    %301 = vector.broadcast %300 : vector<8x1xf32> to vector<8x8xf32>
    %302 = arith.subf %298, %301 : vector<8x8xf32>
    %303 = math.exp %302 : vector<8x8xf32>
    %cst_119 = arith.constant dense<0.000000e+00> : vector<8xf32>
    %304 = vector.multi_reduction <add>, %303, %cst_119 [1] : vector<8x8xf32> to vector<8xf32>
    %305 = vector.shape_cast %304 : vector<8xf32> to vector<8x1xf32>
    %306 = vector.broadcast %305 : vector<8x1xf32> to vector<8x8xf32>
    %307 = arith.divf %303, %306 : vector<8x8xf32>
    %cst_120 = arith.constant dense<0.000000e+00> : vector<8x16xf32>
    %308 = tpu.matmul %307, %293, %cst_120 {dimension_numbers = #tpu.dot_dimension_numbers<[1], [0], [0], [1], [0, 0, 1, 1], [], []>} : vector<8x8xf32>, vector<8x16xf32>, vector<8x16xf32> -> vector<8x16xf32>
    %309 = tpu.concatenate %290, %308 in 1 : vector<8x16xf32>, vector<8x16xf32> -> vector<8x32xf32>
    %310 = tpu.concatenate %268, %309 in 0 : vector<8x32xf32>, vector<8x32xf32> -> vector<16x32xf32>
    %c1_121 = arith.constant 1 : index
    %c0_122 = arith.constant 0 : index
    %c0_123 = arith.constant 0 : index
    %311 = vector.load %arg8[%c1_121, %c0_122, %c0_123] : memref<2x32x32xf32, #tpu.memory_space<vmem>>, vector<1x32x32xf32>
    %312 = vector.shape_cast %311 : vector<1x32x32xf32> to vector<32x32xf32>
    %cst_124 = arith.constant dense<0.000000e+00> : vector<16x32xf32>
    %313 = tpu.matmul %310, %312, %cst_124 {dimension_numbers = #tpu.dot_dimension_numbers<[1], [0], [0], [1], [0, 0, 1, 1], [], []>} : vector<16x32xf32>, vector<32x32xf32>, vector<16x32xf32> -> vector<16x32xf32>
    %c1_125 = arith.constant 1 : index
    %c0_126 = arith.constant 0 : index
    %c0_127 = arith.constant 0 : index
    %314 = vector.load %arg9[%c1_125, %c0_126, %c0_127] : memref<2x1x32xf32, #tpu.memory_space<vmem>>, vector<1x1x32xf32>
    %315 = vector.shape_cast %314 : vector<1x1x32xf32> to vector<1x32xf32>
    %316 = vector.broadcast %315 : vector<1x32xf32> to vector<16x32xf32>
    %317 = arith.addf %313, %316 : vector<16x32xf32>
    %318 = arith.addf %214, %317 : vector<16x32xf32>
    %c1_128 = arith.constant 1 : index
    %c0_129 = arith.constant 0 : index
    %c0_130 = arith.constant 0 : index
    %319 = vector.load %arg10[%c1_128, %c0_129, %c0_130] : memref<2x1x32xf32, #tpu.memory_space<vmem>>, vector<1x1x32xf32>
    %320 = vector.shape_cast %319 : vector<1x1x32xf32> to vector<1x32xf32>
    %c1_131 = arith.constant 1 : index
    %c0_132 = arith.constant 0 : index
    %c0_133 = arith.constant 0 : index
    %321 = vector.load %arg11[%c1_131, %c0_132, %c0_133] : memref<2x1x32xf32, #tpu.memory_space<vmem>>, vector<1x1x32xf32>
    %322 = vector.shape_cast %321 : vector<1x1x32xf32> to vector<1x32xf32>
    %cst_134 = arith.constant dense<0.000000e+00> : vector<16xf32>
    %323 = vector.multi_reduction <add>, %318, %cst_134 [1] : vector<16x32xf32> to vector<16xf32>
    %324 = vector.shape_cast %323 : vector<16xf32> to vector<16x1xf32>
    %cst_135 = arith.constant 3.200000e+01 : f32
    %325 = vector.broadcast %cst_135 : f32 to vector<16x1xf32>
    %326 = arith.divf %324, %325 : vector<16x1xf32>
    %327 = vector.broadcast %326 : vector<16x1xf32> to vector<16x32xf32>
    %328 = arith.subf %318, %327 : vector<16x32xf32>
    %329 = arith.mulf %328, %328 : vector<16x32xf32>
    %cst_136 = arith.constant dense<0.000000e+00> : vector<16xf32>
    %330 = vector.multi_reduction <add>, %329, %cst_136 [1] : vector<16x32xf32> to vector<16xf32>
    %331 = vector.shape_cast %330 : vector<16xf32> to vector<16x1xf32>
    %cst_137 = arith.constant 3.200000e+01 : f32
    %332 = vector.broadcast %cst_137 : f32 to vector<16x1xf32>
    %333 = arith.divf %331, %332 : vector<16x1xf32>
    %334 = vector.broadcast %326 : vector<16x1xf32> to vector<16x32xf32>
    %335 = arith.subf %318, %334 : vector<16x32xf32>
    %cst_138 = arith.constant 9.99999996E-13 : f32
    %336 = vector.broadcast %cst_138 : f32 to vector<16x1xf32>
    %337 = arith.addf %333, %336 : vector<16x1xf32>
    %338 = math.rsqrt %337 : vector<16x1xf32>
    %339 = vector.broadcast %338 : vector<16x1xf32> to vector<16x32xf32>
    %340 = arith.mulf %335, %339 : vector<16x32xf32>
    %341 = vector.broadcast %320 : vector<1x32xf32> to vector<16x32xf32>
    %342 = arith.mulf %340, %341 : vector<16x32xf32>
    %343 = vector.broadcast %322 : vector<1x32xf32> to vector<16x32xf32>
    %344 = arith.addf %342, %343 : vector<16x32xf32>
    %c1_139 = arith.constant 1 : index
    %c0_140 = arith.constant 0 : index
    %c0_141 = arith.constant 0 : index
    %345 = vector.load %arg12[%c1_139, %c0_140, %c0_141] : memref<2x32x64xf32, #tpu.memory_space<vmem>>, vector<1x32x64xf32>
    %346 = vector.shape_cast %345 : vector<1x32x64xf32> to vector<32x64xf32>
    %cst_142 = arith.constant dense<0.000000e+00> : vector<16x64xf32>
    %347 = tpu.matmul %344, %346, %cst_142 {dimension_numbers = #tpu.dot_dimension_numbers<[1], [0], [0], [1], [0, 0, 1, 1], [], []>} : vector<16x32xf32>, vector<32x64xf32>, vector<16x64xf32> -> vector<16x64xf32>
    %c1_143 = arith.constant 1 : index
    %c0_144 = arith.constant 0 : index
    %c0_145 = arith.constant 0 : index
    %348 = vector.load %arg13[%c1_143, %c0_144, %c0_145] : memref<2x1x64xf32, #tpu.memory_space<vmem>>, vector<1x1x64xf32>
    %349 = vector.shape_cast %348 : vector<1x1x64xf32> to vector<1x64xf32>
    %350 = vector.broadcast %349 : vector<1x64xf32> to vector<16x64xf32>
    %351 = arith.addf %347, %350 : vector<16x64xf32>
    %cst_146 = arith.constant 5.000000e-01 : f32
    %352 = vector.broadcast %cst_146 : f32 to vector<16x64xf32>
    %353 = arith.mulf %352, %351 : vector<16x64xf32>
    %cst_147 = arith.constant 0.707106769 : f32
    %354 = vector.broadcast %cst_147 : f32 to vector<16x64xf32>
    %355 = arith.mulf %351, %354 : vector<16x64xf32>
    %356 = math.erf %355 : vector<16x64xf32>
    %cst_148 = arith.constant 1.000000e+00 : f32
    %357 = vector.broadcast %cst_148 : f32 to vector<16x64xf32>
    %358 = arith.addf %357, %356 : vector<16x64xf32>
    %359 = arith.mulf %353, %358 : vector<16x64xf32>
    %c1_149 = arith.constant 1 : index
    %c0_150 = arith.constant 0 : index
    %c0_151 = arith.constant 0 : index
    %360 = vector.load %arg14[%c1_149, %c0_150, %c0_151] : memref<2x64x32xf32, #tpu.memory_space<vmem>>, vector<1x64x32xf32>
    %361 = vector.shape_cast %360 : vector<1x64x32xf32> to vector<64x32xf32>
    %cst_152 = arith.constant dense<0.000000e+00> : vector<16x32xf32>
    %362 = tpu.matmul %359, %361, %cst_152 {dimension_numbers = #tpu.dot_dimension_numbers<[1], [0], [0], [1], [0, 0, 1, 1], [], []>} : vector<16x64xf32>, vector<64x32xf32>, vector<16x32xf32> -> vector<16x32xf32>
    %c1_153 = arith.constant 1 : index
    %c0_154 = arith.constant 0 : index
    %c0_155 = arith.constant 0 : index
    %363 = vector.load %arg15[%c1_153, %c0_154, %c0_155] : memref<2x1x32xf32, #tpu.memory_space<vmem>>, vector<1x1x32xf32>
    %364 = vector.shape_cast %363 : vector<1x1x32xf32> to vector<1x32xf32>
    %365 = vector.broadcast %364 : vector<1x32xf32> to vector<16x32xf32>
    %366 = arith.addf %362, %365 : vector<16x32xf32>
    %367 = arith.addf %344, %366 : vector<16x32xf32>
    %c1_156 = arith.constant 1 : index
    %c0_157 = arith.constant 0 : index
    %c0_158 = arith.constant 0 : index
    %368 = vector.load %arg16[%c1_156, %c0_157, %c0_158] : memref<2x1x32xf32, #tpu.memory_space<vmem>>, vector<1x1x32xf32>
    %369 = vector.shape_cast %368 : vector<1x1x32xf32> to vector<1x32xf32>
    %c1_159 = arith.constant 1 : index
    %c0_160 = arith.constant 0 : index
    %c0_161 = arith.constant 0 : index
    %370 = vector.load %arg17[%c1_159, %c0_160, %c0_161] : memref<2x1x32xf32, #tpu.memory_space<vmem>>, vector<1x1x32xf32>
    %371 = vector.shape_cast %370 : vector<1x1x32xf32> to vector<1x32xf32>
    %cst_162 = arith.constant dense<0.000000e+00> : vector<16xf32>
    %372 = vector.multi_reduction <add>, %367, %cst_162 [1] : vector<16x32xf32> to vector<16xf32>
    %373 = vector.shape_cast %372 : vector<16xf32> to vector<16x1xf32>
    %cst_163 = arith.constant 3.200000e+01 : f32
    %374 = vector.broadcast %cst_163 : f32 to vector<16x1xf32>
    %375 = arith.divf %373, %374 : vector<16x1xf32>
    %376 = vector.broadcast %375 : vector<16x1xf32> to vector<16x32xf32>
    %377 = arith.subf %367, %376 : vector<16x32xf32>
    %378 = arith.mulf %377, %377 : vector<16x32xf32>
    %cst_164 = arith.constant dense<0.000000e+00> : vector<16xf32>
    %379 = vector.multi_reduction <add>, %378, %cst_164 [1] : vector<16x32xf32> to vector<16xf32>
    %380 = vector.shape_cast %379 : vector<16xf32> to vector<16x1xf32>
    %cst_165 = arith.constant 3.200000e+01 : f32
    %381 = vector.broadcast %cst_165 : f32 to vector<16x1xf32>
    %382 = arith.divf %380, %381 : vector<16x1xf32>
    %383 = vector.broadcast %375 : vector<16x1xf32> to vector<16x32xf32>
    %384 = arith.subf %367, %383 : vector<16x32xf32>
    %cst_166 = arith.constant 9.99999996E-13 : f32
    %385 = vector.broadcast %cst_166 : f32 to vector<16x1xf32>
    %386 = arith.addf %382, %385 : vector<16x1xf32>
    %387 = math.rsqrt %386 : vector<16x1xf32>
    %388 = vector.broadcast %387 : vector<16x1xf32> to vector<16x32xf32>
    %389 = arith.mulf %384, %388 : vector<16x32xf32>
    %390 = vector.broadcast %369 : vector<1x32xf32> to vector<16x32xf32>
    %391 = arith.mulf %389, %390 : vector<16x32xf32>
    %392 = vector.broadcast %371 : vector<1x32xf32> to vector<16x32xf32>
    %393 = arith.addf %391, %392 : vector<16x32xf32>
    %c2 = arith.constant 2 : index
    %c0_167 = arith.constant 0 : index
    %c0_168 = arith.constant 0 : index
    %394 = vector.load %arg28[%c2, %c0_167, %c0_168] : memref<3x16x32xf32, #tpu.memory_space<vmem>>, vector<1x16x32xf32>
    %395 = vector.shape_cast %394 : vector<1x16x32xf32> to vector<16x32xf32>
    %396 = vector.shape_cast %393 : vector<16x32xf32> to vector<1x16x32xf32>
    tpu.vector_store %arg28[%c2, %c0_167, %c0_168], %396 {strides = array<i32>} : memref<3x16x32xf32, #tpu.memory_space<vmem>>, vector<1x16x32xf32>,
    %c0_169 = arith.constant 0 : index
    %c0_170 = arith.constant 0 : index
    %397 = vector.load %arg29[%c0_169, %c0_170] : memref<16x32xf32, #tpu.memory_space<vmem>>, vector<16x32xf32>
    tpu.vector_store %arg29[%c0_169, %c0_170], %393 {strides = array<i32>} : memref<16x32xf32, #tpu.memory_space<vmem>>, vector<16x32xf32>,
    %c0_171 = arith.constant 0 : index
    %c0_172 = arith.constant 0 : index
    %398 = vector.load %arg18[%c0_171, %c0_172] : memref<32x32xf32, #tpu.memory_space<vmem>>, vector<32x32xf32>
    %cst_173 = arith.constant dense<0.000000e+00> : vector<16x32xf32>
    %399 = tpu.matmul %393, %398, %cst_173 {dimension_numbers = #tpu.dot_dimension_numbers<[1], [0], [0], [1], [0, 0, 1, 1], [], []>} : vector<16x32xf32>, vector<32x32xf32>, vector<16x32xf32> -> vector<16x32xf32>
    %c0_174 = arith.constant 0 : index
    %c0_175 = arith.constant 0 : index
    %400 = vector.load %arg19[%c0_174, %c0_175] : memref<1x32xf32, #tpu.memory_space<vmem>>, vector<1x32xf32>
    %401 = vector.broadcast %400 : vector<1x32xf32> to vector<16x32xf32>
    %402 = arith.addf %399, %401 : vector<16x32xf32>
    %cst_176 = arith.constant 5.000000e-01 : f32
    %403 = vector.broadcast %cst_176 : f32 to vector<16x32xf32>
    %404 = arith.mulf %403, %402 : vector<16x32xf32>
    %cst_177 = arith.constant 0.707106769 : f32
    %405 = vector.broadcast %cst_177 : f32 to vector<16x32xf32>
    %406 = arith.mulf %402, %405 : vector<16x32xf32>
    %407 = math.erf %406 : vector<16x32xf32>
    %cst_178 = arith.constant 1.000000e+00 : f32
    %408 = vector.broadcast %cst_178 : f32 to vector<16x32xf32>
    %409 = arith.addf %408, %407 : vector<16x32xf32>
    %410 = arith.mulf %404, %409 : vector<16x32xf32>
    %c0_179 = arith.constant 0 : index
    %c0_180 = arith.constant 0 : index
    %411 = vector.load %arg20[%c0_179, %c0_180] : memref<1x32xf32, #tpu.memory_space<vmem>>, vector<1x32xf32>
    %c0_181 = arith.constant 0 : index
    %c0_182 = arith.constant 0 : index
    %412 = vector.load %arg21[%c0_181, %c0_182] : memref<1x32xf32, #tpu.memory_space<vmem>>, vector<1x32xf32>
    %cst_183 = arith.constant dense<0.000000e+00> : vector<16xf32>
    %413 = vector.multi_reduction <add>, %410, %cst_183 [1] : vector<16x32xf32> to vector<16xf32>
    %414 = vector.shape_cast %413 : vector<16xf32> to vector<16x1xf32>
    %cst_184 = arith.constant 3.200000e+01 : f32
    %415 = vector.broadcast %cst_184 : f32 to vector<16x1xf32>
    %416 = arith.divf %414, %415 : vector<16x1xf32>
    %417 = vector.broadcast %416 : vector<16x1xf32> to vector<16x32xf32>
    %418 = arith.subf %410, %417 : vector<16x32xf32>
    %419 = arith.mulf %418, %418 : vector<16x32xf32>
    %cst_185 = arith.constant dense<0.000000e+00> : vector<16xf32>
    %420 = vector.multi_reduction <add>, %419, %cst_185 [1] : vector<16x32xf32> to vector<16xf32>
    %421 = vector.shape_cast %420 : vector<16xf32> to vector<16x1xf32>
    %cst_186 = arith.constant 3.200000e+01 : f32
    %422 = vector.broadcast %cst_186 : f32 to vector<16x1xf32>
    %423 = arith.divf %421, %422 : vector<16x1xf32>
    %424 = vector.broadcast %416 : vector<16x1xf32> to vector<16x32xf32>
    %425 = arith.subf %410, %424 : vector<16x32xf32>
    %cst_187 = arith.constant 9.99999996E-13 : f32
    %426 = vector.broadcast %cst_187 : f32 to vector<16x1xf32>
    %427 = arith.addf %423, %426 : vector<16x1xf32>
    %428 = math.rsqrt %427 : vector<16x1xf32>
    %429 = vector.broadcast %428 : vector<16x1xf32> to vector<16x32xf32>
    %430 = arith.mulf %425, %429 : vector<16x32xf32>
    %431 = vector.broadcast %411 : vector<1x32xf32> to vector<16x32xf32>
    %432 = arith.mulf %430, %431 : vector<16x32xf32>
    %433 = vector.broadcast %412 : vector<1x32xf32> to vector<16x32xf32>
    %434 = arith.addf %432, %433 : vector<16x32xf32>
    %c0_188 = arith.constant 0 : index
    %c0_189 = arith.constant 0 : index
    %435 = vector.load %arg22[%c0_188, %c0_189] : memref<32x128xf32, #tpu.memory_space<vmem>>, vector<32x128xf32>
    %cst_190 = arith.constant dense<0.000000e+00> : vector<16x128xf32>
    %436 = tpu.matmul %434, %435, %cst_190 {dimension_numbers = #tpu.dot_dimension_numbers<[1], [0], [0], [1], [0, 0, 1, 1], [], []>} : vector<16x32xf32>, vector<32x128xf32>, vector<16x128xf32> -> vector<16x128xf32>
    %c0_191 = arith.constant 0 : index
    %c0_192 = arith.constant 0 : index
    %437 = vector.load %arg23[%c0_191, %c0_192] : memref<1x128xf32, #tpu.memory_space<vmem>>, vector<1x128xf32>
    %438 = vector.broadcast %437 : vector<1x128xf32> to vector<16x128xf32>
    %439 = arith.addf %436, %438 : vector<16x128xf32>
    %c0_193 = arith.constant 0 : index
    %c0_194 = arith.constant 0 : index
    %440 = vector.load %arg30[%c0_193, %c0_194] : memref<16x128xf32, #tpu.memory_space<vmem>>, vector<16x128xf32>
    tpu.vector_store %arg30[%c0_193, %c0_194], %439 {strides = array<i32>} : memref<16x128xf32, #tpu.memory_space<vmem>>, vector<16x128xf32>,
    %c0_195 = arith.constant 0 : index
    %c0_196 = arith.constant 0 : index
    %441 = vector.load %arg24[%c0_195, %c0_196] : memref<32x16xf32, #tpu.memory_space<vmem>>, vector<32x16xf32>
    %cst_197 = arith.constant dense<0.000000e+00> : vector<16x16xf32>
    %442 = tpu.matmul %393, %441, %cst_197 {dimension_numbers = #tpu.dot_dimension_numbers<[1], [0], [0], [1], [0, 0, 1, 1], [], []>} : vector<16x32xf32>, vector<32x16xf32>, vector<16x16xf32> -> vector<16x16xf32>
    %c0_198 = arith.constant 0 : index
    %c0_199 = arith.constant 0 : index
    %443 = vector.load %arg25[%c0_198, %c0_199] : memref<1x16xf32, #tpu.memory_space<vmem>>, vector<1x16xf32>
    %444 = vector.broadcast %443 : vector<1x16xf32> to vector<16x16xf32>
    %445 = arith.addf %442, %444 : vector<16x16xf32>
    %cst_200 = arith.constant 0.000000e+00 : f32
    %446 = vector.broadcast %cst_200 : f32 to vector<16x16xf32>
    %447 = arith.maximumf %445, %446 : vector<16x16xf32>
    %c0_201 = arith.constant 0 : index
    %c0_202 = arith.constant 0 : index
    %448 = vector.load %arg26[%c0_201, %c0_202] : memref<16x128xf32, #tpu.memory_space<vmem>>, vector<16x128xf32>
    %cst_203 = arith.constant dense<0.000000e+00> : vector<16x128xf32>
    %449 = tpu.matmul %447, %448, %cst_203 {dimension_numbers = #tpu.dot_dimension_numbers<[1], [0], [0], [1], [0, 0, 1, 1], [], []>} : vector<16x16xf32>, vector<16x128xf32>, vector<16x128xf32> -> vector<16x128xf32>
    %c0_204 = arith.constant 0 : index
    %c0_205 = arith.constant 0 : index
    %450 = vector.load %arg27[%c0_204, %c0_205] : memref<1x128xf32, #tpu.memory_space<vmem>>, vector<1x128xf32>
    %451 = vector.broadcast %450 : vector<1x128xf32> to vector<16x128xf32>
    %452 = arith.addf %449, %451 : vector<16x128xf32>
    %c0_206 = arith.constant 0 : index
    %c0_207 = arith.constant 0 : index
    %453 = vector.load %arg31[%c0_206, %c0_207] : memref<16x128xf32, #tpu.memory_space<vmem>>, vector<16x128xf32>
    tpu.vector_store %arg31[%c0_206, %c0_207], %452 {strides = array<i32>} : memref<16x128xf32, #tpu.memory_space<vmem>>, vector<16x128xf32>,
    return
  }
}

</mosaic_0001>

<bundles_post_ra>
// kernel: _lambda_.1
= control target key start
LH: loop header
LB: loop body
LE: loop exit
PB: predicated region body
PF: predicated region fallthrough
CT: control target
= control target key end

     0   :  { %s3935_s6 = smov 1   ;;  %s3936_s10 = smov 2   ;;  %s4514_s0 = inlined_call_operand.smem [shape: u32[32], index: -1, kind: input, shape index: {}] }
   0x1   :  { %s3990_s5 = sld [smem:[%s4514_s0]]   ;;  %s3937_s14 = smov 3  }
   0x2   :  { %s3995_s9 = sld [smem:[%s4514_s0 + %s3935_s6]]   ;;  %s3938_s18 = smov 4  }
   0x3   :  { %s4000_s13 = sld [smem:[%s4514_s0 + %s3936_s10]]   ;;  %s3939_s22 = smov 5  }
   0x4   :  { %s4005_s17 = sld [smem:[%s4514_s0 + %s3937_s14]]   ;;  %s3940_s26 = smov 6  }
   0x5   :  { %s4010_s21 = sld [smem:[%s4514_s0 + %s3938_s18]]   ;;  %s3941_s30 = smov 7  }
   0x6   :  { %s4015_s25 = sld [smem:[%s4514_s0 + %s3939_s22]]   ;;  %s3942_s4 = smov 8  }
   0x7   :  { %s4020_s29 = sld [smem:[%s4514_s0 + %s3940_s26]]   ;;  %s3943_s10 = smov 9  }
   0x8   :  { %s4025_s3 = sld [smem:[%s4514_s0 + %s3941_s30]]   ;;  %s3944_s15 = smov 10  }
   0x9   :  { %s4030_s8 = sld [smem:[%s4514_s0 + %s3942_s4]]   ;;  %s3945_s20 = smov 11  }
   0xa   :  { %s4035_s14 = sld [smem:[%s4514_s0 + %s3943_s10]]   ;;  %s3946_s26 = smov 12  }
   0xb   :  { %s4040_s19 = sld [smem:[%s4514_s0 + %s3944_s15]]   ;;  %s3947_s1 = smov 13  }
   0xc   :  { %s4045_s24 = sld [smem:[%s4514_s0 + %s3945_s20]]   ;;  %s3948_s7 = smov 14  }
   0xd   :  { %s4050_s30 = sld [smem:[%s4514_s0 + %s3946_s26]]   ;;  %s3949_s15 = smov 15  }
   0xe   :  { %s4055_s6 = sld [smem:[%s4514_s0 + %s3947_s1]]   ;;  %s3950_s22 = smov 16  }
   0xf   :  { %s4060_s12 = sld [smem:[%s4514_s0 + %s3948_s7]]   ;;  %s3951_s28 = smov 17  }
  0x10   :  { %s4065_s20 = sld [smem:[%s4514_s0 + %s3949_s15]]   ;;  %s3952_s7 = smov 18  }
  0x11   :  { %4524 = sst [smem:[#allocation12_spill]] %s4040_s19  ;;  %s3953_s15 = smov 19  }
  0x12   :  { %4525 = sst [smem:[#allocation13_spill]] %s4045_s24 }
  0x13   :  { %s4070_s27 = sld [smem:[%s4514_s0 + %s3950_s22]]   ;;  %s3954_s22 = smov 20  }
  0x14   :  { %s4075_s4 = sld [smem:[%s4514_s0 + %s3951_s28]]   ;;  %s3955_s28 = smov 21  }
  0x15   :  { %4526 = sst [smem:[#allocation14_spill]] %s4060_s12 }
  0x16   :  { %s4080_s12 = sld [smem:[%s4514_s0 + %s3952_s7]]   ;;  %s3956_s7 = smov 22  }
  0x17   :  { %s4085_s24 = sld [smem:[%s4514_s0 + %s3953_s15]]   ;;  %s3957_s15 = smov 23  }
  0x19   :  { %4527 = sst [smem:[#allocation15_spill]] %s4070_s27 }
  0x1a   :  { %4528 = sst [smem:[#allocation16_spill]] %s4075_s4 }
  0x1b   :  { %s4090_s27 = sld [smem:[%s4514_s0 + %s3954_s22]]   ;;  %s3958_s22 = smov 24  }
  0x1c   :  { %4529 = sst [smem:[#allocation17_spill]] %s4080_s12 }
  0x1d   :  { %4530 = sst [smem:[#allocation18_spill]] %s4085_s24 }
  0x1e   :  { %s4095_s4 = sld [smem:[%s4514_s0 + %s3955_s28]]   ;;  %s3959_s28 = smov 25  }
  0x1f   :  { %s4100_s12 = sld [smem:[%s4514_s0 + %s3956_s7]]   ;;  %s3960_s7 = smov 26  }
  0x20   :  { %s4105_s24 = sld [smem:[%s4514_s0 + %s3957_s15]]   ;;  %s3961_s15 = smov 27  }
  0x21   :  { %4531 = sst [smem:[#allocation19_spill]] %s4090_s27 }
  0x22   :  { %s4110_s27 = sld [smem:[%s4514_s0 + %s3958_s22]]   ;;  %s3962_s22 = smov 28  }
  0x24   :  { %4532 = sst [smem:[#allocation20_spill]] %s4095_s4 }
  0x25   :  { %4533 = sst [smem:[#allocation21_spill]] %s4100_s12 }
  0x26   :  { %4534 = sst [smem:[#allocation22_spill]] %s4105_s24 }
  0x27   :  { %s4115_s4 = sld [smem:[%s4514_s0 + %s3959_s28]]   ;;  %s3963_s28 = smov 29  }
  0x28   :  { %4535 = sst [smem:[#allocation23_spill]] %s4110_s27 }
  0x29   :  { %s4120_s12 = sld [smem:[%s4514_s0 + %s3960_s7]]   ;;  %s3964_s7 = smov 30  }
  0x2a   :  { %s4125_s24 = sld [smem:[%s4514_s0 + %s3961_s15]]   ;;  %s3965_s15 = smov 31  }
  0x2b   :  { %s4130_s27 = sld [smem:[%s4514_s0 + %s3962_s22]]  }
  0x2c   :  { %s4135_s19 = sld [smem:[%s4514_s0 + %s3963_s28]]  }
  0x2f   :  { %4536 = sst [smem:[#allocation24_spill]] %s4120_s12 }
  0x30   :  { %4537 = sst [smem:[#allocation25_spill]] %s4125_s24 }
  0x31   :  { %s4140_s12 = sld [smem:[%s4514_s0 + %s3964_s7]]  }
  0x32   :  { %s4145_s24 = sld [smem:[%s4514_s0 + %s3965_s15]]  }
  0x33   :  { %69 = vsyncpa [#allocation3], 0 }
  0x34   :  { %70 = vsyncpa [#allocation6], 0 }
  0x35   :  { %71 = vsyncpa [#allocation4], 0  ;;  %s3966_s22 = smov [#allocation5]   ;;  %s3967_s26 = smov [#allocation2]  }
  0x36   :  { %s117_s23 = sshll.u32 %s3966_s22, 4  ;;  %s103_s28 = sshll.u32 %s3967_s26, 4  ;;  %s118_s23 = int_to_ptr.vmem [resolvable:$true] %s117_s23  ;;  %s4147_s28 = int_to_ptr.vmem [resolvable:$true] %s103_s28 }
  0x37   :  { %s3841_s1 = scalar_lea.hbm %s4065_s20, 32 }
  0x38   :  { %p3842_p0 = scmp.ne.s32.totalorder %s4065_s20, %s3841_s1  ;;  %p3845_p1 = scmp.lt.u32.totalorder %s3841_s1, %s4065_s20 }
  0x3a   :  { %p3847_p2 = pnand %p3845_p1, %p3842_p0 }
  0x3c   :  { %3850 = shalt.err (!%p3847_p2)
}
  0x3d   :  { %s3851_s0 = scalar_lea.vmem %s118_s23, 32  ;;  %p3856_p4 = scmp.lt.s32.totalorder %s118_s23, %s118_s23 }
  0x3e   :  { %p3852_p3 = scmp.ne.s32.totalorder %s118_s23, %s3851_s0  ;;  %p3857_p5 = scmp.lt.s32.totalorder %s3851_s0, %s3851_s0 }
  0x40   :  { %p3858_p6 = por %p3857_p5, %p3856_p4 }
  0x42   :  { %p3859_p7 = pnand %p3858_p6, %p3852_p3 }
  0x44   :  { %3862 = shalt.err (!%p3859_p7)
}
  0x45   :  { %s3968_s2 = smov 16   ;;  %s3969_s7 = smov 1  }
  0x46   :  { %123 = dma.hbm_to_vmem [thread:$0]  %s4065_s20, 32, %s118_s23, [#allocation6], %s3968_s2, %s3968_s2, %s3969_s7  }
  0x47   :  { %s3863_s10 = scalar_lea.hbm %s4055_s6, 32 }
  0x48   :  { %p3864_p8 = scmp.ne.s32.totalorder %s4055_s6, %s3863_s10  ;;  %p3867_p9 = scmp.lt.u32.totalorder %s3863_s10, %s4055_s6 }
  0x4a   :  { %p3869_p10 = pnand %p3867_p9, %p3864_p8 }
  0x4c   :  { %3872 = shalt.err (!%p3869_p10)
}
  0x4d   :  { %s3873_s11 = scalar_lea.vmem %s4147_s28, 32  ;;  %p3878_p12 = scmp.lt.s32.totalorder %s4147_s28, %s4147_s28 }
  0x4e   :  { %p3874_p11 = scmp.ne.s32.totalorder %s4147_s28, %s3873_s11  ;;  %p3879_p13 = scmp.lt.s32.totalorder %s3873_s11, %s3873_s11 }
  0x50   :  { %p3880_p0 = por %p3879_p13, %p3878_p12 }
  0x52   :  { %p3881_p1 = pnand %p3880_p0, %p3874_p11 }
  0x54   :  { %3884 = shalt.err (!%p3881_p1)
}
  0x55   :  { %109 = dma.hbm_to_vmem [thread:$0]  %s4055_s6, 32, %s4147_s28, [#allocation3], %s3968_s2, %s3968_s2, %s3969_s7  }
  0x56   :  { %s3970_s20 = smov [#allocation7]   ;;  %s3885_s16 = scalar_lea.hbm %s4115_s4, 16 }
  0x57   :  { %s148_s15 = sshll.u32 %s3970_s20, 4  ;;  %p3886_p2 = scmp.ne.s32.totalorder %s4115_s4, %s3885_s16  ;;  %s149_s15 = int_to_ptr.vmem [resolvable:$true] %s148_s15 }
  0x58   :  { %p3889_p3 = scmp.lt.u32.totalorder %s3885_s16, %s4115_s4 }
  0x5a   :  { %p3891_p4 = pnand %p3889_p3, %p3886_p2 }
  0x5c   :  { %3894 = shalt.err (!%p3891_p4)
}
  0x5d   :  { %s3895_s18 = scalar_lea.vmem %s149_s15, 16  ;;  %s3899_s22 = scalar_lea.vmem %s149_s15, 32 }
  0x5e   :  { %p3896_p5 = scmp.ne.s32.totalorder %s149_s15, %s3895_s18  ;;  %p3900_p6 = scmp.lt.s32.totalorder %s149_s15, %s149_s15 }
  0x5f   :  { %p3901_p7 = scmp.lt.s32.totalorder %s3899_s22, %s3895_s18 }
  0x61   :  { %p3902_p8 = por %p3901_p7, %p3900_p6 }
  0x63   :  { %p3903_p9 = pnand %p3902_p8, %p3896_p5 }
  0x65   :  { %3906 = shalt.err (!%p3903_p9)
}
  0x66   :  { %151 = dma.hbm_to_vmem [thread:$0]  %s4115_s4, 16, %s149_s15, [#allocation6]  }
  0x67   :  { %3929 = dma.done.wait [#allocation3], 32  }
  0x68   :  { %3930 = vsyncadd [#allocation3], 4294967264 }
  0x69   :  { %3931 = dma.done.wait [#allocation6], 48  }
  0x6a   :  { %3932 = vsyncadd [#allocation6], 4294967248  ;;  %v3971_v0 = vmov 0   ;;  %v165_v1 = vld [vmem:[%s3990_s5] sm:$0xff]  ;;  %v182_v3 = vld [vmem:[%s4000_s13 + $0x8] sm:$0xff]  ;;  %v3972_v15 = vmov 0.0   ;;  %v167_v16 = vlaneseq }
  0x6b   :  { %3772 = vset.pattern.permute.xlu0 %v3971_v0  ;;  %v181_v2 = vld [vmem:[%s4000_s13] sm:$0xff]  ;;  %v183_v4 = vld [vmem:[%s4000_s13 + $0x10] sm:$0xff]  ;;  %v184_v5 = vld [vmem:[%s4000_s13 + $0x18] sm:$0xff]  ;;  %vm190_vm0 = vcmask 523264   ;;  %vm274_vm3 = vcmask 261120   ;;  %vm3973_vm4 = vmmov 0  }
  0x6c   :  { %170 = vperm.xlu0 %3772, %v165_v1   ;;  %v166_v6 = vld [vmem:[%s3990_s5 + $0x8] sm:$0xff]  ;;  %v3601_v7 = vpack.c.bf16 %v182_v3, %v181_v2  ;;  %v3605_v8 = vpack.c.bf16 %v184_v5, %v183_v4  ;;  %v185_v9 = vld [vmem:[%s4000_s13 + $0x20] sm:$0xff]  ;;  %v187_v12 = vld [vmem:[%s4000_s13 + $0x30] sm:$0xff]  ;;  %v168_v17 = vand.u32 127, %v167_v16  ;;  %s3974_s5 = smov 80   ;;  %vm416_vm5 = vcmask 130048  }
  0x6d   :  { %v186_v10 = vld [vmem:[%s4000_s13 + $0x28] sm:$0xff]  ;;  %v188_v13 = vld [vmem:[%s4000_s13 + $0x38] sm:$0xff]  ;;  %v189_v22 = vld [vmem:[%s4005_s17] sm:$0xff]  ;;  %s3975_s13 = smov 96   ;;  %s3976_s17 = smov 112   ;;  %vm497_vm6 = vcmask 64512  }
  0x6e   :  { %3602 = vmatprep.subr.bf16.mxu0 %v3601_v7  ;;  %v3609_v11 = vpack.c.bf16 %v186_v10, %v185_v9  ;;  %v3613_v14 = vpack.c.bf16 %v188_v13, %v187_v12  ;;  %v321_v39 = vld [vmem:[%s4020_s29] sm:$0xff]  ;;  %v322_v40 = vld [vmem:[%s4020_s29 + $0x8] sm:$0xff]  ;;  %v323_v41 = vld [vmem:[%s4020_s29 + $0x10] sm:$0xff]  ;;  %s4539_s6 = sld [smem:[#allocation13_spill]]  ;;  %s4540_s4 = sld [smem:[#allocation14_spill]] }
  0x6f   :  { %3604 = vmatpush3.bf16.msra.mxu0 %v3601_v7  ;;  %v3617_v42 = vpack.c.bf16 %v322_v40, %v321_v39  ;;  %v324_v43 = vld [vmem:[%s4020_s29 + $0x18] sm:$0xff]  ;;  %v3136_v52 = vld [vmem:[%s4010_s21] ss:$0 sm:$0xff]  ;;  %s3978_s21 = smov 48   ;;  %s4541_s23 = sld [smem:[#allocation15_spill]] }
  0x70   :  { %173 = vperm.xlu0 %3772, %v166_v6   ;;  %3606 = vmatprep.subr.bf16.mxu0 %v3605_v8  ;;  %v3621_v44 = vpack.c.bf16 %v324_v43, %v323_v41  ;;  %v3137_v54 = vld [vmem:[%s4015_s25] ss:$0 sm:$0xff]  ;;  %s4538_s25 = sld [smem:[#allocation12_spill]]  ;;  %s4542_s26 = sld [smem:[#allocation16_spill]] }
  0x71   :  { %3618 = vmatprep.subr.bf16.mxu1 %v3617_v42  ;;  %v3138_v61 = vld [vmem:[%s4025_s3] ss:$0 sm:$0xff]  ;;  %s4549_s28 = sld [smem:[#allocation20_spill]]  ;;  %s3979_s1 = smov [#allocation8]  }
  0x72   :  { %3620 = vmatpush3.bf16.msra.mxu1 %v3617_v42  ;;  %v320_v10 = vld [vmem:[%s3995_s9] sm:$0x3]  ;;  %s3977_s9 = smov 64   ;;  %s3078_s0 = sshll.u32 %s3979_s1, 4  ;;  %s3079_s0 = int_to_ptr.vmem [resolvable:$true] %s3078_s0 }
  0x73   :  { %3608 = vmatpush3.bf16.msra.mxu0 %v3605_v8  ;;  %3622 = vmatprep.subr.bf16.mxu1 %v3621_v44  ;;  %v493_v8 = vshrl.u32 %v167_v16, 7  ;;  %p3912_p11 = scmp.lt.s32.totalorder %s3079_s0, %s3079_s0 }
  0x74   :  { %3610 = vmatprep.subr.bf16.mxu0 %v3609_v11 }
  0x75   :  { %v494_v9 = vsub.s32 0, %v493_v8 }
  0x76   :  { %3624 = vmatpush3.bf16.msra.mxu1 %v3621_v44 }
  0x77   :  { %3612 = vmatpush3.bf16.msra.mxu0 %v3609_v11  ;;  %3388 = vmatprep.subr.mxu1 %v3972_v15  ;;  %v4254_v11 = vrot.slane %v320_v10, %v494_v9  ;;  %v1099_v9 = vld [vmem:[%s4030_s8] sm:$0xff] }
  0x78   :  { %3614 = vmatprep.subr.bf16.mxu0 %v3613_v14 }
  0x7b   :  { %3616 = vmatpush3.bf16.msra.mxu0 %v3613_v14 }
  0x7c   :  { %3398 = vmatprep.subr.mxu0 %v3972_v15 }
  0xeb   :  { %v171_v18 = vpop.permute.xlu0 %170 }
  0xec   :  { %vm175_vm1 = vcmp.eq.s32.totalorder %v168_v17, %v171_v18 }
  0xed   :  { %v3132_v19 = vsel %vm175_vm1, 1.0, %v3972_v15 }
  0xee   :  { %3374 = vmatprep.mubr.msk.f32.mxu0 %vm190_vm0, %v3132_v19 }
  0xef   :  { %v174_v20 = vpop.permute.xlu0 %173 }
  0xf0   :  { %vm176_vm2 = vcmp.eq.s32.totalorder %v168_v17, %v174_v20 }
  0xf1   :  { %v3133_v21 = vsel %vm176_vm2, 1.0, %v3972_v15 }
  0xf2   :  { %3375 = vmatmul.mubr.msk.f32.vlgmr.msra.gmra.mrb[0].mxu0 %vm190_vm0, %v3133_v21 }
  0xf3   :  { %3400 = vmatprep.mubr.msk.f32.mxu0 %vm3973_vm4, %v3972_v15 }
 0x1c5   :  { %v3376_v23 = vpop.f32.mrb[0].mxu0 }
 0x1c6   :  { %v263_v24 = vpop.f32.mrb[1].mxu0  ;;  %v269_v26 = vadd.f32 %v3376_v23, %v189_v22 }
 0x1c7   :  { %v264_v25 = vadd.f32 %v263_v24, %v189_v22  ;;  %v837_v22 = vsub.s32 1, %v493_v8 }
 0x1c8   :  { %v278_v28 = vsel %vm274_vm3, %v269_v26, 0.0 }
 0x1c9   :  { %v275_v27 = vsel %vm274_vm3, %v264_v25, 0.0  ;;  %v4260_v24 = vrot.slane %v320_v10, %v837_v22  ;;  %v1100_v10 = vld [vmem:[%s4030_s8 + $0x8] sm:$0xff] }
 0x1ca   :  { %276 = vadd.xlane.f32.xlu1 %v275_v27 }
 0x1ce   :  { %279 = vadd.xlane.f32.xlu1 %v278_v28 }
 0x257   :  { %v277_v29 = vpop.xlane.xlu1 %276 }
 0x258   :  { %v282_v30 = vmul.f32 0.03125, %v277_v29 }
 0x25a   :  { %v284_v31 = vsub.f32 %v264_v25, %v282_v30 }
 0x25b   :  { %v280_v32 = vpop.xlane.xlu1 %279 }
 0x25c   :  { %v283_v33 = vmul.f32 0.03125, %v280_v32  ;;  %v286_v34 = vmul.f32 %v284_v31, %v284_v31 }
 0x25e   :  { %v285_v35 = vsub.f32 %v269_v26, %v283_v33  ;;  %v288_v36 = vsel %vm274_vm3, %v286_v34, 0.0 }
 0x25f   :  { %289 = vadd.xlane.f32.xlu0 %v288_v36 }
 0x260   :  { %v287_v37 = vmul.f32 %v285_v35, %v285_v35 }
 0x262   :  { %v291_v38 = vsel %vm274_vm3, %v287_v37, 0.0 }
 0x263   :  { %292 = vadd.xlane.f32.xlu1 %v291_v38 }
 0x2ec   :  { %v290_v45 = vpop.xlane.xlu0 %289 }
 0x2ed   :  { %v294_v46 = vmul.f32 0.03125, %v290_v45 }
 0x2ef   :  { %v296_v47 = vadd.f32 1e-12, %v294_v46 }
 0x2f0   :  { %v293_v48 = vpop.xlane.xlu1 %292 }
 0x2f1   :  { %3773 = vrsqrt.f32 %v296_v47  ;;  %v295_v49 = vmul.f32 0.03125, %v293_v48 }
 0x2f3   :  { %v297_v50 = vadd.f32 1e-12, %v295_v49 }
 0x2f5   :  { %3775 = vrsqrt.f32 %v297_v50 }
 0x2fb   :  { %v3774_v51 = vpop.eup %3773 }
 0x2fc   :  { %v300_v53 = vmul.f32 %v3774_v51, %v284_v31 }
 0x2fe   :  { %v308_v55 = vmul.f32 %v3136_v52, %v300_v53 }
 0x2ff   :  { %v3776_v56 = vpop.eup %3775 }
 0x300   :  { %v301_v57 = vmul.f32 %v3776_v56, %v285_v35  ;;  %v4198_v58 = vadd.f32 %v3137_v54, %v308_v55 }
 0x302   :  { %v309_v59 = vmul.f32 %v3136_v52, %v301_v57  ;;  %318 = vst.msk [vmem:[%s4130_s27] sm:$0xff] %vm274_vm3, %v4198_v58  ;;  %3385 = vmatprep.mubr.msk.f32.mxu1 %vm274_vm3, %v4198_v58 }
 0x304   :  { %v4205_v60 = vadd.f32 %v3137_v54, %v309_v59 }
 0x306   :  { %319 = vst.msk [vmem:[%s4130_s27 + $0x8] sm:$0xff] %vm274_vm3, %v4205_v60  ;;  %3386 = vmatmul.mubr.msk.f32.vlgmr.msra.gmra.mrb[0].mxu1 %vm274_vm3, %v4205_v60 }
 0x307   :  { %3390 = vmatprep.mubr.msk.f32.mxu1 %vm3973_vm4, %v3972_v15 }
 0x3d9   :  { %v3387_v62 = vpop.f32.mrb[0].mxu1 }
 0x3da   :  { %v4217_v63 = vadd.f32 %v3387_v62, %v3138_v61  ;;  %v404_v0 = vpop.f32.mrb[1].mxu1 }
 0x3db   :  { %v4219_v1 = vadd.f32 %v3138_v61, %v404_v0 }
 0x3dc   :  { %929 = vrot.lane.b32.xlu0 %v4217_v63, %s3974_s5 }
 0x3dd   :  { %414 = vrot.lane.b32.xlu1 %v4219_v1, %s3975_s13 }
 0x3e1   :  { %587 = vrot.lane.b32.xlu1 %v4219_v1, %s3974_s5 }
 0x3e5   :  { %585 = vrot.lane.b32.xlu1 %v4219_v1, %s3976_s17 }
 0x3e9   :  { %758 = vrot.lane.b32.xlu1 %v4217_v63, %s3975_s13 }
 0x3ed   :  { %927 = vrot.lane.b32.xlu1 %v4217_v63, %s3976_s17 }
 0x44e   :  { %v930_v6 = vpop.permute.xlu0 %929 }
 0x44f   :  { %v415_v2 = vpop.permute.xlu1 %414 }
 0x450   :  { %3389 = vmatpush3.xpose.msk.msra.mxu1 %vm416_vm5, %v415_v2 }
 0x451   :  { %3393 = vmatprep.subr.mxu1 %v3972_v15 }
 0x453   :  { %3391 = vmatmul.mubr.msk.f32.vlgmr.msra.gmra.mrb[2].mxu1 %vm416_vm5, %v4219_v1  ;;  %v588_v3 = vpop.permute.xlu1 %587 }
 0x454   :  { %3399 = vmatpush3.xpose.msk.msra.mxu0 %vm416_vm5, %v588_v3  ;;  %3395 = vmatprep.mubr.msk.f32.mxu1 %vm3973_vm4, %v3972_v15 }
 0x455   :  { %3408 = vmatprep.subr.mxu0 %v3972_v15 }
 0x457   :  { %v586_v4 = vpop.permute.xlu1 %585 }
 0x458   :  { %3401 = vmatmul.mubr.msk.f32.vlgmr.msra.gmra.mrb[2].mxu0 %vm416_vm5, %v586_v4 }
 0x459   :  { %3410 = vmatprep.mubr.msk.f32.mxu0 %vm3973_vm4, %v3972_v15 }
 0x45b   :  { %v759_v5 = vpop.permute.xlu1 %758 }
 0x45c   :  { %3409 = vmatpush3.xpose.msk.msra.mxu0 %vm416_vm5, %v759_v5 }
 0x45d   :  { %3418 = vmatprep.subr.mxu0 %v3972_v15 }
 0x45f   :  { %3411 = vmatmul.mubr.msk.f32.vlgmr.msra.gmra.mrb[4].mxu0 %vm416_vm5, %v4217_v63  ;;  %v928_v7 = vpop.permute.xlu1 %927 }
 0x460   :  { %3419 = vmatpush3.xpose.msk.msra.mxu0 %vm416_vm5, %v930_v6  ;;  %3420 = vmatprep.mubr.msk.f32.mxu0 %vm3973_vm4, %v3972_v15 }
 0x463   :  { %3421 = vmatmul.mubr.msk.f32.vlgmr.msra.gmra.mrb[6].mxu0 %vm416_vm5, %v928_v7 }
 0x526   :  { %v487_v12 = vpop.f32.mrb[2].mxu1 }
 0x527   :  { %v491_v13 = vmul.f32 0.25, %v487_v12  ;;  %v3392_v14 = vpop.f32.mrb[3].mxu1  ;;  %v3625_v12 = vpack.c.bf16 %v1100_v10, %v1099_v9  ;;  %v1341_v10 = vld [vmem:[%s4540_s4 + $0x10] sm:$0xff] }
 0x528   :  { %v1102_v14 = vld [vmem:[%s4030_s8 + $0x18] sm:$0xff] }
 0x529   :  { %v496_v17 = vadd.f32 %v4254_v11, %v491_v13  ;;  %v1101_v13 = vld [vmem:[%s4030_s8 + $0x10] sm:$0xff]  ;;  %3626 = vmatprep.subr.bf16.mxu0 %v3625_v12 }
 0x52a   :  { %3628 = vmatpush3.bf16.msra.mxu0 %v3625_v12  ;;  %v1342_v12 = vld [vmem:[%s4540_s4 + $0x18] sm:$0xff] }
 0x52b   :  { %v659_v18 = vpop.f32.mrb[2].mxu0  ;;  %v498_v19 = vsel %vm497_vm6, %v496_v17, -inf }
 0x52c   :  { %v663_v20 = vmul.f32 0.25, %v659_v18  ;;  %499 = vmax.xlane.f32.xlu1 %v498_v19  ;;  %v3402_v21 = vpop.f32.mrb[3].mxu0 }
 0x52e   :  { %v664_v23 = vadd.f32 %v663_v20, %v4254_v11 }
 0x530   :  { %v665_v16 = vsel %vm497_vm6, %v664_v23, -inf }
 0x531   :  { %666 = vmax.xlane.f32.xlu0 %v665_v16 }
 0x532   :  { %v830_v25 = vpop.f32.mrb[4].mxu0 }
 0x533   :  { %v834_v26 = vmul.f32 0.25, %v830_v25  ;;  %v3412_v27 = vpop.f32.mrb[5].mxu0 }
 0x535   :  { %v839_v28 = vadd.f32 %v4260_v24, %v834_v26 }
 0x536   :  { %v1001_v29 = vpop.f32.mrb[6].mxu0 }
 0x537   :  { %v1005_v30 = vmul.f32 0.25, %v1001_v29  ;;  %v3422_v31 = vpop.f32.mrb[7].mxu0  ;;  %v840_v32 = vsel %vm497_vm6, %v839_v28, -inf }
 0x538   :  { %841 = vmax.xlane.f32.xlu1 %v840_v32 }
 0x539   :  { %v1006_v33 = vadd.f32 %v1005_v30, %v4260_v24  ;;  %v3153_v30 = vld [vmem:[%s4035_s14] ss:$0 sm:$0xff] }
 0x53b   :  { %v1007_v34 = vsel %vm497_vm6, %v1006_v33, -inf }
 0x53c   :  { %1008 = vmax.xlane.f32.xlu1 %v1007_v34 }
 0x54d   :  { %509 = vrot.lane.b32.xlu1 %v4219_v1, %s3977_s9 }
 0x5b9   :  { %v500_v35 = vpop.xlane.xlu1 %499 }
 0x5ba   :  { %v501_v36 = vsub.f32 %v496_v17, %v500_v35  ;;  %v3629_v17 = vpack.c.bf16 %v1102_v14, %v1101_v13  ;;  %v3645_v13 = vpack.c.bf16 %v1342_v12, %v1341_v10  ;;  %v1343_v14 = vld [vmem:[%s4540_s4 + $0x20] sm:$0xff] }
 0x5bc   :  { %v502_v37 = vmul.f32 1.442695, %v501_v36  ;;  %3630 = vmatprep.subr.bf16.mxu0 %v3629_v17 }
 0x5bd   :  { %3632 = vmatpush3.bf16.msra.mxu0 %v3629_v17  ;;  %v1344_v17 = vld [vmem:[%s4540_s4 + $0x28] sm:$0xff] }
 0x5be   :  { %3777 = vpow2.f32 %v502_v37  ;;  %v667_v38 = vpop.xlane.xlu0 %666 }
 0x5bf   :  { %v668_v39 = vsub.f32 %v664_v23, %v667_v38 }
 0x5c1   :  { %v669_v40 = vmul.f32 1.442695, %v668_v39 }
 0x5c3   :  { %3779 = vpow2.f32 %v669_v40 }
 0x5c5   :  { %v842_v41 = vpop.xlane.xlu1 %841 }
 0x5c6   :  { %v843_v42 = vsub.f32 %v839_v28, %v842_v41 }
 0x5c8   :  { %v3778_v43 = vpop.eup %3777  ;;  %v844_v44 = vmul.f32 1.442695, %v843_v42 }
 0x5c9   :  { %v1009_v45 = vpop.xlane.xlu1 %1008  ;;  %v504_v46 = vsel %vm497_vm6, %v3778_v43, 0.0 }
 0x5ca   :  { %3781 = vpow2.f32 %v844_v44  ;;  %v1010_v47 = vsub.f32 %v1006_v33, %v1009_v45  ;;  %505 = vadd.xlane.f32.xlu1 %v504_v46 }
 0x5cc   :  { %v1011_v48 = vmul.f32 1.442695, %v1010_v47  ;;  %v1237_v47 = vld [vmem:[%s4050_s30] sm:$0xff] }
 0x5cd   :  { %v3780_v49 = vpop.eup %3779  ;;  %v510_v50 = vpop.permute.xlu1 %509 }
 0x5ce   :  { %3783 = vpow2.f32 %v1011_v48  ;;  %3394 = vmatpush3.msra.mxu1 %v510_v50  ;;  %v671_v51 = vsel %vm497_vm6, %v3780_v49, 0.0  ;;  %v1238_v48 = vld [vmem:[%s4050_s30 + $0x8] sm:$0xff]  ;;  %v1239_v50 = vld [vmem:[%s4050_s30 + $0x10] sm:$0xff] }
 0x5cf   :  { %672 = vadd.xlane.f32.xlu0 %v671_v51  ;;  %3403 = vmatprep.subr.mxu1 %v3972_v15  ;;  %v1240_v51 = vld [vmem:[%s4050_s30 + $0x18] sm:$0xff] }
 0x5d4   :  { %v3782_v52 = vpop.eup %3781 }
 0x5d5   :  { %v846_v53 = vsel %vm497_vm6, %v3782_v52, 0.0 }
 0x5d6   :  { %847 = vadd.xlane.f32.xlu1 %v846_v53 }
 0x5d8   :  { %v3784_v54 = vpop.eup %3783 }
 0x5d9   :  { %v1013_v55 = vsel %vm497_vm6, %v3784_v54, 0.0 }
 0x5da   :  { %1014 = vadd.xlane.f32.xlu0 %v1013_v55 }
 0x5e7   :  { %851 = vrot.lane.b32.xlu1 %v4217_v63, %s3977_s9 }
 0x5eb   :  { %1018 = vrot.lane.b32.xlu1 %v4217_v63, %s3978_s21 }
 0x5f0   :  { %676 = vrot.lane.b32.xlu0 %v4219_v1, %s3978_s21 }
 0x657   :  { %v506_v56 = vpop.xlane.xlu1 %505 }
 0x658   :  { %3785 = vrcp.f32 %v506_v56 }
 0x65c   :  { %v673_v57 = vpop.xlane.xlu0 %672 }
 0x65d   :  { %3787 = vrcp.f32 %v673_v57 }
 0x662   :  { %v3786_v59 = vpop.eup %3785 }
 0x663   :  { %v508_v61 = vmul.f32 %v3786_v59, %v3778_v43  ;;  %v848_v62 = vpop.xlane.xlu1 %847 }
 0x664   :  { %3789 = vrcp.f32 %v848_v62  ;;  %v3156_v62 = vld [vmem:[%s4538_s25] ss:$0 sm:$0xff] }
 0x665   :  { %3396 = vmatmul.mubr.msk.f32.vlgmr.msra.gmra.mrb[4].mxu1 %vm497_vm6, %v508_v61 }
 0x666   :  { %3405 = vmatprep.mubr.msk.f32.mxu1 %vm3973_vm4, %v3972_v15 }
 0x667   :  { %v1015_v0 = vpop.xlane.xlu0 %1014  ;;  %v3788_v2 = vpop.eup %3787 }
 0x668   :  { %3791 = vrcp.f32 %v1015_v0  ;;  %v675_v63 = vmul.f32 %v3788_v2, %v3780_v49  ;;  %v852_v3 = vpop.permute.xlu1 %851  ;;  %v3633_v49 = vpack.c.bf16 %v1238_v48, %v1237_v47  ;;  %v3157_v2 = vld [vmem:[%s4539_s6] ss:$0 sm:$0xff] }
 0x66b   :  { %v677_v4 = vpop.permute.xlu0 %676 }
 0x66c   :  { %3404 = vmatpush3.msra.mxu1 %v677_v4  ;;  %v1019_v6 = vpop.permute.xlu1 %1018 }
 0x66d   :  { %3406 = vmatmul.mubr.msk.f32.vlgmr.msra.gmra.mrb[6].mxu1 %vm497_vm6, %v675_v63  ;;  %3413 = vmatprep.subr.mxu1 %v3972_v15 }
 0x66e   :  { %v3790_v1 = vpop.eup %3789  ;;  %3414 = vmatpush3.msra.mxu1 %v852_v3  ;;  %3415 = vmatprep.mubr.msk.f32.mxu1 %vm3973_vm4, %v3972_v15 }
 0x66f   :  { %v850_v5 = vmul.f32 %v3790_v1, %v3782_v52  ;;  %3423 = vmatprep.subr.mxu1 %v3972_v15  ;;  %v3637_v52 = vpack.c.bf16 %v1240_v51, %v1239_v50 }
 0x671   :  { %3416 = vmatmul.mubr.msk.f32.vlgmr.msra.gmra.mrb[8].mxu1 %vm497_vm6, %v850_v5 }
 0x672   :  { %v3792_v7 = vpop.eup %3791  ;;  %3424 = vmatpush3.msra.mxu1 %v1019_v6  ;;  %3425 = vmatprep.mubr.msk.f32.mxu1 %vm3973_vm4, %v3972_v15 }
 0x673   :  { %v1017_v8 = vmul.f32 %v3792_v7, %v3784_v54  ;;  %3634 = vmatprep.subr.bf16.mxu1 %v3633_v49  ;;  %v1339_v7 = vld [vmem:[%s4540_s4] sm:$0xff] }
 0x675   :  { %3426 = vmatmul.mubr.msk.f32.vlgmr.msra.gmra.mrb[10].mxu1 %vm497_vm6, %v1017_v8  ;;  %v1340_v8 = vld [vmem:[%s4540_s4 + $0x8] sm:$0xff] }
 0x676   :  { %3636 = vmatpush3.bf16.msra.mxu1 %v3633_v49  ;;  %v3641_v9 = vpack.c.bf16 %v1340_v8, %v1339_v7  ;;  %v3165_v8 = vld [vmem:[%s4542_s26] ss:$0 sm:$0xff] }
 0x677   :  { %3638 = vmatprep.subr.bf16.mxu1 %v3637_v52 }
 0x678   :  { %3642 = vmatprep.subr.bf16.mxu0 %v3641_v9 }
 0x67a   :  { %3640 = vmatpush3.bf16.msra.mxu1 %v3637_v52 }
 0x738   :  { %v581_v18 = vpop.f32.mrb[4].mxu1 }
 0x739   :  { %v3397_v19 = vpop.f32.mrb[5].mxu1 }
 0x73a   :  { %v1345_v19 = vld [vmem:[%s4540_s4 + $0x30] sm:$0xff] }
 0x740   :  { %v748_v20 = vpop.f32.mrb[6].mxu1 }
 0x741   :  { %753 = vrot.lane.b32.xlu0 %v748_v20, %s3968_s2  ;;  %v3407_v21 = vpop.f32.mrb[7].mxu1  ;;  %v1346_v20 = vld [vmem:[%s4540_s4 + $0x38] sm:$0xff] }
 0x742   :  { %v3653_v21 = vpack.c.bf16 %v1346_v20, %v1345_v19 }
 0x744   :  { %v923_v22 = vpop.f32.mrb[8].mxu1 }
 0x745   :  { %v3417_v23 = vpop.f32.mrb[9].mxu1 }
 0x748   :  { %v1090_v16 = vpop.f32.mrb[10].mxu1 }
 0x749   :  { %1095 = vrot.lane.b32.xlu1 %v1090_v16, %s3968_s2  ;;  %v3427_v25 = vpop.f32.mrb[11].mxu1 }
 0x7b3   :  { %v754_v26 = vpop.permute.xlu0 %753 }
 0x7b4   :  { %v756_v27 = vsel %vm416_vm5, %v581_v18, %v754_v26  ;;  %v3649_v18 = vpack.c.bf16 %v1344_v17, %v1343_v14  ;;  %v3173_v17 = vld [vmem:[%s4025_s3 + $0x1] ss:$0 sm:$0xff]  ;;  %s4544_s3 = sld [smem:[#allocation23_spill]] }
 0x7b5   :  { %3436 = vmatprep.mubr.msk.f32.mxu0 %vm274_vm3, %v756_v27 }
 0x7bb   :  { %v1096_v28 = vpop.permute.xlu1 %1095 }
 0x7bc   :  { %v1098_v29 = vsel %vm416_vm5, %v923_v22, %v1096_v28  ;;  %v3158_v22 = vld [vmem:[#allocation2] ss:$0 sm:$0xff] }
 0x7bd   :  { %3437 = vmatmul.mubr.msk.f32.vlgmr.msra.gmra.mrb[8].mxu0 %vm274_vm3, %v1098_v29 }
 0x7be   :  { %3644 = vmatpush3.bf16.msra.mxu0 %v3641_v9 }
 0x7bf   :  { %3646 = vmatprep.subr.bf16.mxu0 %v3645_v13 }
 0x7c2   :  { %3648 = vmatpush3.bf16.msra.mxu0 %v3645_v13 }
 0x7c3   :  { %3650 = vmatprep.subr.bf16.mxu0 %v3649_v18 }
 0x7c6   :  { %3652 = vmatpush3.bf16.msra.mxu0 %v3649_v18 }
 0x7c7   :  { %3654 = vmatprep.subr.bf16.mxu0 %v3653_v21 }
 0x7ca   :  { %3656 = vmatpush3.bf16.msra.mxu0 %v3653_v21 }
 0x7cb   :  { %3490 = vmatprep.subr.mxu0 %v3972_v15 }
 0x890   :  { %v3438_v31 = vpop.f32.mrb[8].mxu0 }
 0x891   :  { %v1188_v32 = vadd.f32 %v3438_v31, %v3153_v30  ;;  %v1182_v33 = vpop.f32.mrb[9].mxu0 }
 0x892   :  { %v1183_v34 = vadd.f32 %v3153_v30, %v1182_v33 }
 0x893   :  { %v1192_v35 = vadd.f32 %v1188_v32, %v4205_v60 }
 0x894   :  { %v1191_v36 = vadd.f32 %v1183_v34, %v4198_v58 }
 0x895   :  { %v1198_v37 = vsel %vm274_vm3, %v1192_v35, 0.0 }
 0x896   :  { %1199 = vadd.xlane.f32.xlu1 %v1198_v37  ;;  %v1195_v38 = vsel %vm274_vm3, %v1191_v36, 0.0  ;;  %v3161_v37 = vld [vmem:[#allocation5] ss:$0 sm:$0xff] }
 0x897   :  { %1196 = vadd.xlane.f32.xlu0 %v1195_v38 }
 0x923   :  { %v1200_v39 = vpop.xlane.xlu1 %1199 }
 0x924   :  { %v1202_v40 = vmul.f32 0.03125, %v1200_v39  ;;  %v1197_v41 = vpop.xlane.xlu0 %1196 }
 0x925   :  { %v1201_v42 = vmul.f32 0.03125, %v1197_v41 }
 0x926   :  { %v1204_v43 = vsub.f32 %v1192_v35, %v1202_v40 }
 0x927   :  { %v1203_v44 = vsub.f32 %v1191_v36, %v1201_v42 }
 0x928   :  { %v1206_v58 = vmul.f32 %v1204_v43, %v1204_v43 }
 0x929   :  { %v1205_v45 = vmul.f32 %v1203_v44, %v1203_v44 }
 0x92a   :  { %v1210_v46 = vsel %vm274_vm3, %v1206_v58, 0.0 }
 0x92b   :  { %v1207_v60 = vsel %vm274_vm3, %v1205_v45, 0.0 }
 0x92c   :  { %1208 = vadd.xlane.f32.xlu0 %v1207_v60 }
 0x930   :  { %1211 = vadd.xlane.f32.xlu0 %v1210_v46 }
 0x9b9   :  { %v1209_v53 = vpop.xlane.xlu0 %1208 }
 0x9ba   :  { %v1213_v54 = vmul.f32 0.03125, %v1209_v53 }
 0x9bc   :  { %v1215_v55 = vadd.f32 1e-12, %v1213_v54  ;;  %v3168_v54 = vld [vmem:[%s4020_s29 + $0x20] sm:$0xff] }
 0x9bd   :  { %v1212_v56 = vpop.xlane.xlu0 %1211 }
 0x9be   :  { %3793 = vrsqrt.f32 %v1215_v55  ;;  %v1214_v57 = vmul.f32 0.03125, %v1212_v56  ;;  %v3169_v55 = vld [vmem:[%s4020_s29 + $0x28] sm:$0xff] }
 0x9bf   :  { %v3657_v56 = vpack.c.bf16 %v3169_v55, %v3168_v54 }
 0x9c0   :  { %v1216_v59 = vadd.f32 1e-12, %v1214_v57  ;;  %v3170_v57 = vld [vmem:[%s4020_s29 + $0x30] sm:$0xff] }
 0x9c1   :  { %3658 = vmatprep.subr.bf16.mxu1 %v3657_v56 }
 0x9c2   :  { %3795 = vrsqrt.f32 %v1216_v59  ;;  %v3171_v59 = vld [vmem:[%s4020_s29 + $0x38] sm:$0xff]  ;;  %s4543_s29 = sld [smem:[#allocation17_spill]] }
 0x9c8   :  { %v3794_v61 = vpop.eup %3793 }
 0x9c9   :  { %v1219_v0 = vmul.f32 %v3794_v61, %v1203_v44  ;;  %v3661_v61 = vpack.c.bf16 %v3171_v59, %v3170_v57 }
 0x9cb   :  { %v1227_v63 = vmul.f32 %v3156_v62, %v1219_v0 }
 0x9cc   :  { %v3796_v3 = vpop.eup %3795 }
 0x9cd   :  { %v1220_v4 = vmul.f32 %v3796_v3, %v1204_v43  ;;  %v1235_v1 = vadd.f32 %v3157_v2, %v1227_v63 }
 0x9cf   :  { %v1228_v5 = vmul.f32 %v3156_v62, %v1220_v4  ;;  %3447 = vmatprep.mubr.msk.f32.mxu1 %vm274_vm3, %v1235_v1 }
 0x9d1   :  { %v1236_v6 = vadd.f32 %v3157_v2, %v1228_v5  ;;  %v3164_v5 = vld [vmem:[%s4541_s23] ss:$0 sm:$0xff] }
 0x9d3   :  { %3448 = vmatmul.mubr.msk.f32.vlgmr.msra.gmra.mrb[12].mxu1 %vm274_vm3, %v1236_v6 }
 0x9d4   :  { %3660 = vmatpush3.bf16.msra.mxu1 %v3657_v56 }
 0x9d5   :  { %3662 = vmatprep.subr.bf16.mxu1 %v3661_v61 }
 0x9d8   :  { %3664 = vmatpush3.bf16.msra.mxu1 %v3661_v61 }
 0x9d9   :  { %3480 = vmatprep.subr.mxu1 %v3972_v15 }
 0xaa6   :  { %v3449_v23 = vpop.f32.mrb[12].mxu1 }
 0xaa7   :  { %v1326_v16 = vadd.f32 %v3449_v23, %v3158_v22  ;;  %v1320_v25 = vpop.f32.mrb[13].mxu1 }
 0xaa8   :  { %v1321_v26 = vadd.f32 %v3158_v22, %v1320_v25 }
 0xaa9   :  { %v1332_v27 = vmul.f32 0.70710677, %v1326_v16  ;;  %v1330_v34 = vmul.f32 0.5, %v1326_v16 }
 0xaaa   :  { %v1331_v28 = vmul.f32 0.70710677, %v1321_v26  ;;  %v1329_v32 = vmul.f32 0.5, %v1321_v26 }
 0xaab   :  { %3797 = verf.f32 %v1332_v27 }
 0xaac   :  { %3799 = verf.f32 %v1331_v28 }
 0xab5   :  { %v3798_v29 = vpop.eup %3797 }
 0xab6   :  { %v3800_v30 = vpop.eup %3799  ;;  %v1336_v31 = vadd.f32 1.0, %v3798_v29 }
 0xab7   :  { %v1335_v33 = vadd.f32 1.0, %v3800_v30 }
 0xab8   :  { %v1338_v36 = vmul.f32 %v1336_v31, %v1330_v34 }
 0xab9   :  { %v1337_v35 = vmul.f32 %v1335_v33, %v1329_v32 }
 0xabb   :  { %3466 = vmatprep.mubr.msk.f32.mxu0 %vm190_vm0, %v1337_v35 }
 0xabc   :  { %3467 = vmatmul.mubr.msk.f32.vlgmr.msra.gmra.mrb[10].mxu0 %vm190_vm0, %v1338_v36 }
 0xabd   :  { %3492 = vmatprep.mubr.msk.f32.mxu0 %vm3973_vm4, %v3972_v15 }
 0xb8f   :  { %v3468_v38 = vpop.f32.mrb[10].mxu0 }
 0xb90   :  { %v1432_v39 = vadd.f32 %v3468_v38, %v3161_v37  ;;  %v1426_v40 = vpop.f32.mrb[11].mxu0 }
 0xb91   :  { %v1427_v41 = vadd.f32 %v3161_v37, %v1426_v40 }
 0xb92   :  { %v1436_v42 = vadd.f32 %v1432_v39, %v1236_v6 }
 0xb93   :  { %v1435_v43 = vadd.f32 %v1427_v41, %v1235_v1 }
 0xb94   :  { %v1442_v44 = vsel %vm274_vm3, %v1436_v42, 0.0 }
 0xb95   :  { %1443 = vadd.xlane.f32.xlu0 %v1442_v44  ;;  %v1439_v45 = vsel %vm274_vm3, %v1435_v43, 0.0 }
 0xb96   :  { %1440 = vadd.xlane.f32.xlu1 %v1439_v45 }
 0xc22   :  { %v1444_v60 = vpop.xlane.xlu0 %1443 }
 0xc23   :  { %v1446_v58 = vmul.f32 0.03125, %v1444_v60  ;;  %v1441_v46 = vpop.xlane.xlu1 %1440 }
 0xc24   :  { %v1445_v47 = vmul.f32 0.03125, %v1441_v46 }
 0xc25   :  { %v1448_v48 = vsub.f32 %v1436_v42, %v1446_v58 }
 0xc26   :  { %v1447_v49 = vsub.f32 %v1435_v43, %v1445_v47 }
 0xc27   :  { %v1450_v50 = vmul.f32 %v1448_v48, %v1448_v48 }
 0xc28   :  { %v1449_v51 = vmul.f32 %v1447_v49, %v1447_v49 }
 0xc29   :  { %v1454_v52 = vsel %vm274_vm3, %v1450_v50, 0.0 }
 0xc2a   :  { %1455 = vadd.xlane.f32.xlu0 %v1454_v52  ;;  %v1451_v53 = vsel %vm274_vm3, %v1449_v51, 0.0 }
 0xc2b   :  { %1452 = vadd.xlane.f32.xlu1 %v1451_v53 }
 0xcb7   :  { %v1456_v62 = vpop.xlane.xlu0 %1455 }
 0xcb8   :  { %v1458_v0 = vmul.f32 0.03125, %v1456_v62  ;;  %v1453_v2 = vpop.xlane.xlu1 %1452 }
 0xcb9   :  { %v1457_v63 = vmul.f32 0.03125, %v1453_v2 }
 0xcba   :  { %v1460_v3 = vadd.f32 1e-12, %v1458_v0 }
 0xcbb   :  { %v1459_v4 = vadd.f32 1e-12, %v1457_v63 }
 0xcbc   :  { %3801 = vrsqrt.f32 %v1460_v3 }
 0xcbd   :  { %3803 = vrsqrt.f32 %v1459_v4 }
 0xcc6   :  { %v3802_v1 = vpop.eup %3801 }
 0xcc7   :  { %v3804_v6 = vpop.eup %3803  ;;  %v1464_v7 = vmul.f32 %v3802_v1, %v1448_v48 }
 0xcc8   :  { %v1463_v9 = vmul.f32 %v3804_v6, %v1447_v49 }
 0xcc9   :  { %v1472_v10 = vmul.f32 %v3164_v5, %v1464_v7 }
 0xcca   :  { %v1471_v12 = vmul.f32 %v3164_v5, %v1463_v9 }
 0xccb   :  { %v4340_v13 = vadd.f32 %v3165_v8, %v1472_v10 }
 0xccc   :  { %v4342_v14 = vadd.f32 %v3165_v8, %v1471_v12 }
 0xccd   :  { %3167 = vst.msk [vmem:[%s4130_s27 + $0x18] sm:$0xff] %vm274_vm3, %v4340_v13 }
 0xcce   :  { %3166 = vst.msk [vmem:[%s4130_s27 + $0x10] sm:$0xff] %vm274_vm3, %v4342_v14  ;;  %3477 = vmatprep.mubr.msk.f32.mxu1 %vm274_vm3, %v4342_v14 }
 0xccf   :  { %3478 = vmatmul.mubr.msk.f32.vlgmr.msra.gmra.mrb[14].mxu1 %vm274_vm3, %v4340_v13 }
 0xcd0   :  { %3482 = vmatprep.mubr.msk.f32.mxu1 %vm3973_vm4, %v3972_v15 }
 0xda2   :  { %v3479_v18 = vpop.f32.mrb[14].mxu1 }
 0xda3   :  { %v1569_v19 = vpop.f32.mrb[15].mxu1  ;;  %v4363_v21 = vadd.f32 %v3479_v18, %v3173_v17 }
 0xda4   :  { %v4357_v20 = vadd.f32 %v3173_v17, %v1569_v19 }
 0xda6   :  { %1746 = vrot.lane.b32.xlu0 %v4357_v20, %s3974_s5  ;;  %1579 = vrot.lane.b32.xlu1 %v4357_v20, %s3975_s13 }
 0xdaa   :  { %2084 = vrot.lane.b32.xlu0 %v4363_v21, %s3974_s5  ;;  %1744 = vrot.lane.b32.xlu1 %v4357_v20, %s3976_s17 }
 0xdae   :  { %1917 = vrot.lane.b32.xlu1 %v4363_v21, %s3975_s13 }
 0xdb2   :  { %2082 = vrot.lane.b32.xlu1 %v4363_v21, %s3976_s17 }
 0xe18   :  { %v1747_v22 = vpop.permute.xlu0 %1746  ;;  %v1580_v23 = vpop.permute.xlu1 %1579 }
 0xe19   :  { %3481 = vmatpush3.xpose.msk.msra.mxu1 %vm416_vm5, %v1580_v23  ;;  %3491 = vmatpush3.xpose.msk.msra.mxu0 %vm416_vm5, %v1747_v22  ;;  %v3188_v23 = vld [vmem:[%s4030_s8 + $0x20] sm:$0xff] }
 0xe1a   :  { %3500 = vmatprep.subr.mxu0 %v3972_v15  ;;  %3485 = vmatprep.subr.mxu1 %v3972_v15 }
 0xe1c   :  { %3483 = vmatmul.mubr.msk.f32.vlgmr.msra.gmra.mrb[16].mxu1 %vm416_vm5, %v4357_v20  ;;  %v1745_v16 = vpop.permute.xlu1 %1744  ;;  %v2085_v26 = vpop.permute.xlu0 %2084 }
 0xe1d   :  { %3493 = vmatmul.mubr.msk.f32.vlgmr.msra.gmra.mrb[12].mxu0 %vm416_vm5, %v1745_v16  ;;  %3487 = vmatprep.mubr.msk.f32.mxu1 %vm3973_vm4, %v3972_v15  ;;  %v3189_v16 = vld [vmem:[%s4030_s8 + $0x28] sm:$0xff] }
 0xe1e   :  { %3502 = vmatprep.mubr.msk.f32.mxu0 %vm3973_vm4, %v3972_v15 }
 0xe20   :  { %v1918_v25 = vpop.permute.xlu1 %1917 }
 0xe21   :  { %3501 = vmatpush3.xpose.msk.msra.mxu0 %vm416_vm5, %v1918_v25  ;;  %v3665_v25 = vpack.c.bf16 %v3189_v16, %v3188_v23  ;;  %v3211_v16 = vld [vmem:[%s4540_s4 + $0x60] sm:$0xff] }
 0xe22   :  { %3510 = vmatprep.subr.mxu0 %v3972_v15 }
 0xe24   :  { %3503 = vmatmul.mubr.msk.f32.vlgmr.msra.gmra.mrb[14].mxu0 %vm416_vm5, %v4363_v21  ;;  %v2083_v27 = vpop.permute.xlu1 %2082 }
 0xe25   :  { %3511 = vmatpush3.xpose.msk.msra.mxu0 %vm416_vm5, %v2085_v26  ;;  %3512 = vmatprep.mubr.msk.f32.mxu0 %vm3973_vm4, %v3972_v15  ;;  %v3190_v26 = vld [vmem:[%s4030_s8 + $0x30] sm:$0xff] }
 0xe26   :  { %3666 = vmatprep.subr.bf16.mxu0 %v3665_v25 }
 0xe28   :  { %3513 = vmatmul.mubr.msk.f32.vlgmr.msra.gmra.mrb[16].mxu0 %vm416_vm5, %v2083_v27  ;;  %v3191_v27 = vld [vmem:[%s4030_s8 + $0x38] sm:$0xff]  ;;  %s4545_s8 = sld [smem:[#allocation18_spill]] }
 0xe29   :  { %3668 = vmatpush3.bf16.msra.mxu0 %v3665_v25  ;;  %v3212_v25 = vld [vmem:[%s4540_s4 + $0x68] sm:$0xff] }
 0xeef   :  { %v1651_v28 = vpop.f32.mrb[16].mxu1 }
 0xef0   :  { %v1655_v29 = vmul.f32 0.25, %v1651_v28  ;;  %v3484_v30 = vpop.f32.mrb[17].mxu1  ;;  %v1818_v31 = vpop.f32.mrb[12].mxu0  ;;  %v3669_v28 = vpack.c.bf16 %v3191_v27, %v3190_v26  ;;  %v3689_v26 = vpack.c.bf16 %v3212_v25, %v3211_v16  ;;  %v3213_v27 = vld [vmem:[%s4540_s4 + $0x70] sm:$0xff] }
 0xef1   :  { %v1822_v32 = vmul.f32 0.25, %v1818_v31  ;;  %v3494_v33 = vpop.f32.mrb[13].mxu0 }
 0xef2   :  { %v1656_v34 = vadd.f32 %v1655_v29, %v4254_v11  ;;  %3670 = vmatprep.subr.bf16.mxu0 %v3669_v28 }
 0xef3   :  { %v1823_v35 = vadd.f32 %v1822_v32, %v4254_v11  ;;  %3672 = vmatpush3.bf16.msra.mxu0 %v3669_v28  ;;  %v3214_v28 = vld [vmem:[%s4540_s4 + $0x78] sm:$0xff] }
 0xef4   :  { %v1657_v36 = vsel %vm497_vm6, %v1656_v34, -inf }
 0xef5   :  { %1658 = vmax.xlane.f32.xlu0 %v1657_v36  ;;  %v1824_v37 = vsel %vm497_vm6, %v1823_v35, -inf }
 0xef6   :  { %1825 = vmax.xlane.f32.xlu1 %v1824_v37 }
 0xef7   :  { %v1989_v38 = vpop.f32.mrb[14].mxu0 }
 0xef8   :  { %v1993_v39 = vmul.f32 0.25, %v1989_v38  ;;  %v3504_v40 = vpop.f32.mrb[15].mxu0 }
 0xef9   :  { %v3193_v40 = vld [vmem:[%s4035_s14 + $0x1] ss:$0 sm:$0xff]  ;;  %s4546_s14 = sld [smem:[#allocation21_spill]] }
 0xefa   :  { %v1994_v41 = vadd.f32 %v1993_v39, %v4260_v24 }
 0xefb   :  { %v2156_v42 = vpop.f32.mrb[16].mxu0 }
 0xefc   :  { %v2160_v43 = vmul.f32 0.25, %v2156_v42  ;;  %v3514_v44 = vpop.f32.mrb[17].mxu0  ;;  %v1995_v45 = vsel %vm497_vm6, %v1994_v41, -inf }
 0xefd   :  { %1996 = vmax.xlane.f32.xlu0 %v1995_v45 }
 0xefe   :  { %v2161_v60 = vadd.f32 %v2160_v43, %v4260_v24 }
 0xf00   :  { %v2162_v11 = vsel %vm497_vm6, %v2161_v60, -inf }
 0xf01   :  { %2163 = vmax.xlane.f32.xlu0 %v2162_v11 }
 0xf07   :  { %1668 = vrot.lane.b32.xlu1 %v4357_v20, %s3977_s9 }
 0xf82   :  { %v1659_v58 = vpop.xlane.xlu0 %1658 }
 0xf83   :  { %v1660_v46 = vsub.f32 %v1656_v34, %v1659_v58  ;;  %v1826_v47 = vpop.xlane.xlu1 %1825 }
 0xf84   :  { %v1827_v48 = vsub.f32 %v1823_v35, %v1826_v47 }
 0xf85   :  { %v1661_v49 = vmul.f32 1.442695, %v1660_v46 }
 0xf86   :  { %v1828_v50 = vmul.f32 1.442695, %v1827_v48 }
 0xf87   :  { %3805 = vpow2.f32 %v1661_v49  ;;  %v1669_v51 = vpop.permute.xlu1 %1668 }
 0xf88   :  { %3807 = vpow2.f32 %v1828_v50  ;;  %3486 = vmatpush3.msra.mxu1 %v1669_v51 }
 0xf89   :  { %3495 = vmatprep.subr.mxu1 %v3972_v15 }
 0xf8a   :  { %v1997_v52 = vpop.xlane.xlu0 %1996 }
 0xf8b   :  { %v1998_v24 = vsub.f32 %v1994_v41, %v1997_v52 }
 0xf8d   :  { %v1999_v53 = vmul.f32 1.442695, %v1998_v24 }
 0xf8e   :  { %v2164_v54 = vpop.xlane.xlu0 %2163 }
 0xf8f   :  { %3809 = vpow2.f32 %v1999_v53  ;;  %v2165_v55 = vsub.f32 %v2161_v60, %v2164_v54  ;;  %v3200_v53 = vld [vmem:[%s4050_s30 + $0x20] sm:$0xff]  ;;  %v3201_v54 = vld [vmem:[%s4050_s30 + $0x28] sm:$0xff] }
 0xf91   :  { %v3806_v56 = vpop.eup %3805  ;;  %v2166_v57 = vmul.f32 1.442695, %v2165_v55  ;;  %v3673_v55 = vpack.c.bf16 %v3201_v54, %v3200_v53 }
 0xf92   :  { %v3808_v59 = vpop.eup %3807  ;;  %v1663_v61 = vsel %vm497_vm6, %v3806_v56, 0.0 }
 0xf93   :  { %3811 = vpow2.f32 %v2166_v57  ;;  %1664 = vadd.xlane.f32.xlu1 %v1663_v61  ;;  %v1830_v62 = vsel %vm497_vm6, %v3808_v59, 0.0  ;;  %v3203_v57 = vld [vmem:[%s4050_s30 + $0x38] sm:$0xff] }
 0xf94   :  { %1831 = vadd.xlane.f32.xlu0 %v1830_v62 }
 0xf99   :  { %v3810_v0 = vpop.eup %3809 }
 0xf9a   :  { %v2001_v2 = vsel %vm497_vm6, %v3810_v0, 0.0 }
 0xf9b   :  { %2002 = vadd.xlane.f32.xlu1 %v2001_v2 }
 0xf9d   :  { %v3812_v63 = vpop.eup %3811 }
 0xf9e   :  { %v2168_v3 = vsel %vm497_vm6, %v3812_v63, 0.0 }
 0xf9f   :  { %2169 = vadd.xlane.f32.xlu0 %v2168_v3 }
 0xfac   :  { %2006 = vrot.lane.b32.xlu1 %v4363_v21, %s3977_s9 }
 0xfb0   :  { %2173 = vrot.lane.b32.xlu1 %v4363_v21, %s3978_s21 }
 0xfb5   :  { %1835 = vrot.lane.b32.xlu0 %v4357_v20, %s3978_s21 }
0x1020   :  { %v1665_v4 = vpop.xlane.xlu1 %1664 }
0x1021   :  { %3813 = vrcp.f32 %v1665_v4  ;;  %v1832_v1 = vpop.xlane.xlu0 %1831 }
0x1022   :  { %3815 = vrcp.f32 %v1832_v1  ;;  %v3198_v1 = vld [vmem:[%s4538_s25 + $0x1] ss:$0 sm:$0xff] }
0x1028   :  { %v2003_v5 = vpop.xlane.xlu1 %2002 }
0x1029   :  { %3817 = vrcp.f32 %v2003_v5 }
0x102b   :  { %v3814_v6 = vpop.eup %3813 }
0x102c   :  { %v1667_v7 = vmul.f32 %v3814_v6, %v3806_v56  ;;  %v2170_v8 = vpop.xlane.xlu0 %2169  ;;  %v3816_v9 = vpop.eup %3815  ;;  %v3202_v56 = vld [vmem:[%s4050_s30 + $0x30] sm:$0xff]  ;;  %v3199_v6 = vld [vmem:[%s4539_s6 + $0x1] ss:$0 sm:$0xff]  ;;  %s4547_s30 = sld [smem:[#allocation24_spill]] }
0x102d   :  { %3819 = vrcp.f32 %v2170_v8  ;;  %v1834_v10 = vmul.f32 %v3816_v9, %v3808_v59  ;;  %v2007_v12 = vpop.permute.xlu1 %2006  ;;  %v3677_v59 = vpack.c.bf16 %v3203_v57, %v3202_v56  ;;  %v2651_v57 = vld [vmem:[%s4543_s29] sm:$0xff] }
0x102e   :  { %3488 = vmatmul.mubr.msk.f32.vlgmr.msra.gmra.mrb[18].mxu1 %vm497_vm6, %v1667_v7 }
0x102f   :  { %3497 = vmatprep.mubr.msk.f32.mxu1 %vm3973_vm4, %v3972_v15 }
0x1030   :  { %v1836_v17 = vpop.permute.xlu0 %1835 }
0x1031   :  { %3496 = vmatpush3.msra.mxu1 %v1836_v17  ;;  %v2174_v20 = vpop.permute.xlu1 %2173 }
0x1032   :  { %3498 = vmatmul.mubr.msk.f32.vlgmr.msra.gmra.mrb[20].mxu1 %vm497_vm6, %v1834_v10  ;;  %3505 = vmatprep.subr.mxu1 %v3972_v15 }
0x1033   :  { %v3818_v18 = vpop.eup %3817  ;;  %3506 = vmatpush3.msra.mxu1 %v2007_v12  ;;  %3507 = vmatprep.mubr.msk.f32.mxu1 %vm3973_vm4, %v3972_v15 }
0x1034   :  { %v2005_v19 = vmul.f32 %v3818_v18, %v3810_v0  ;;  %3515 = vmatprep.subr.mxu1 %v3972_v15  ;;  %v3207_v18 = vld [vmem:[%s4540_s4 + $0x40] sm:$0xff] }
0x1036   :  { %3508 = vmatmul.mubr.msk.f32.vlgmr.msra.gmra.mrb[22].mxu1 %vm497_vm6, %v2005_v19  ;;  %v3208_v19 = vld [vmem:[%s4540_s4 + $0x48] sm:$0xff] }
0x1037   :  { %v3820_v21 = vpop.eup %3819  ;;  %3516 = vmatpush3.msra.mxu1 %v2174_v20  ;;  %3517 = vmatprep.mubr.msk.f32.mxu1 %vm3973_vm4, %v3972_v15  ;;  %v3681_v20 = vpack.c.bf16 %v3208_v19, %v3207_v18  ;;  %v3220_v19 = vld [vmem:[%s4541_s23 + $0x1] ss:$0 sm:$0xff] }
0x1038   :  { %v2172_v22 = vmul.f32 %v3820_v21, %v3812_v63  ;;  %3674 = vmatprep.subr.bf16.mxu1 %v3673_v55  ;;  %v3209_v21 = vld [vmem:[%s4540_s4 + $0x50] sm:$0xff] }
0x1039   :  { %3682 = vmatprep.subr.bf16.mxu0 %v3681_v20 }
0x103a   :  { %3518 = vmatmul.mubr.msk.f32.vlgmr.msra.gmra.mrb[24].mxu1 %vm497_vm6, %v2172_v22  ;;  %v3210_v22 = vld [vmem:[%s4540_s4 + $0x58] sm:$0xff] }
0x103b   :  { %3676 = vmatpush3.bf16.msra.mxu1 %v3673_v55  ;;  %v3685_v23 = vpack.c.bf16 %v3210_v22, %v3209_v21  ;;  %v3221_v22 = vld [vmem:[%s4542_s26 + $0x1] ss:$0 sm:$0xff] }
0x103c   :  { %3678 = vmatprep.subr.bf16.mxu1 %v3677_v59 }
0x103f   :  { %3680 = vmatpush3.bf16.msra.mxu1 %v3677_v59  ;;  %v2652_v59 = vld [vmem:[%s4543_s29 + $0x8] sm:$0xff] }
0x1101   :  { %v1740_v29 = vpop.f32.mrb[18].mxu1 }
0x1102   :  { %v3489_v30 = vpop.f32.mrb[19].mxu1 }
0x1103   :  { %v3204_v30 = vld [vmem:[#allocation2 + $0x1] ss:$0 sm:$0xff] }
0x1105   :  { %v1907_v31 = vpop.f32.mrb[20].mxu1 }
0x1106   :  { %1912 = vrot.lane.b32.xlu0 %v1907_v31, %s3968_s2  ;;  %v3499_v15 = vpop.f32.mrb[21].mxu1 }
0x1109   :  { %v2078_v32 = vpop.f32.mrb[22].mxu1 }
0x110a   :  { %v3509_v33 = vpop.f32.mrb[23].mxu1 }
0x110d   :  { %v2245_v34 = vpop.f32.mrb[24].mxu1 }
0x110e   :  { %2250 = vrot.lane.b32.xlu1 %v2245_v34, %s3968_s2  ;;  %v3519_v35 = vpop.f32.mrb[25].mxu1  ;;  %s3907_s2 = scalar_lea.vmem %s3079_s0, 256 }
0x110f   :  { %p3908_p10 = scmp.ne.s32.totalorder %s3079_s0, %s3907_s2  ;;  %p3913_p12 = scmp.lt.s32.totalorder %s3907_s2, %s3907_s2 }
0x1111   :  { %p3914_p13 = por %p3913_p12, %p3912_p11 }
0x1113   :  { %p3915_p0 = pnand %p3914_p13, %p3908_p10 }
0x1178   :  { %v1913_v36 = vpop.permute.xlu0 %1912 }
0x1179   :  { %v1915_v37 = vsel %vm416_vm5, %v1740_v29, %v1913_v36  ;;  %v3693_v29 = vpack.c.bf16 %v3214_v28, %v3213_v27  ;;  %v3224_v28 = vld [vmem:[%s4545_s8] ss:$0 sm:$0xff] }
0x117a   :  { %3528 = vmatprep.mubr.msk.f32.mxu0 %vm274_vm3, %v1915_v37 }
0x1180   :  { %v2251_v38 = vpop.permute.xlu1 %2250 }
0x1181   :  { %v2253_v39 = vsel %vm416_vm5, %v2078_v32, %v2251_v38 }
0x1182   :  { %3529 = vmatmul.mubr.msk.f32.vlgmr.msra.gmra.mrb[18].mxu0 %vm274_vm3, %v2253_v39 }
0x1183   :  { %3684 = vmatpush3.bf16.msra.mxu0 %v3681_v20 }
0x1184   :  { %3686 = vmatprep.subr.bf16.mxu0 %v3685_v23 }
0x1187   :  { %3688 = vmatpush3.bf16.msra.mxu0 %v3685_v23 }
0x1188   :  { %3690 = vmatprep.subr.bf16.mxu0 %v3689_v26 }
0x118b   :  { %3692 = vmatpush3.bf16.msra.mxu0 %v3689_v26 }
0x118c   :  { %3694 = vmatprep.subr.bf16.mxu0 %v3693_v29 }
0x118f   :  { %3696 = vmatpush3.bf16.msra.mxu0 %v3693_v29 }
0x1255   :  { %v3530_v41 = vpop.f32.mrb[18].mxu0 }
0x1256   :  { %v2345_v42 = vadd.f32 %v3530_v41, %v3193_v40  ;;  %v2339_v43 = vpop.f32.mrb[19].mxu0 }
0x1257   :  { %v2340_v44 = vadd.f32 %v3193_v40, %v2339_v43 }
0x1258   :  { %v2349_v45 = vadd.f32 %v2345_v42, %v4340_v13 }
0x1259   :  { %v2348_v60 = vadd.f32 %v2340_v44, %v4342_v14  ;;  %v3215_v44 = vld [vmem:[#allocation5 + $0x1] ss:$0 sm:$0xff] }
0x125a   :  { %v2357_v11 = vsel %vm274_vm3, %v2349_v45, 0.0 }
0x125b   :  { %2358 = vadd.xlane.f32.xlu1 %v2357_v11  ;;  %v2354_v58 = vsel %vm274_vm3, %v2348_v60, 0.0 }
0x125c   :  { %2355 = vadd.xlane.f32.xlu0 %v2354_v58 }
0x12e8   :  { %v2359_v46 = vpop.xlane.xlu1 %2358 }
0x12e9   :  { %v2361_v47 = vmul.f32 0.03125, %v2359_v46  ;;  %v2356_v48 = vpop.xlane.xlu0 %2355 }
0x12ea   :  { %v2360_v49 = vmul.f32 0.03125, %v2356_v48 }
0x12eb   :  { %v2363_v50 = vsub.f32 %v2349_v45, %v2361_v47 }
0x12ec   :  { %v2362_v51 = vsub.f32 %v2348_v60, %v2360_v49 }
0x12ed   :  { %v2365_v14 = vmul.f32 %v2363_v50, %v2363_v50 }
0x12ee   :  { %v2364_v52 = vmul.f32 %v2362_v51, %v2362_v51 }
0x12ef   :  { %v2369_v24 = vsel %vm274_vm3, %v2365_v14, 0.0 }
0x12f0   :  { %v2366_v13 = vsel %vm274_vm3, %v2364_v52, 0.0 }
0x12f1   :  { %2367 = vadd.xlane.f32.xlu0 %v2366_v13 }
0x12f5   :  { %2370 = vadd.xlane.f32.xlu0 %v2369_v24 }
0x137e   :  { %v2368_v61 = vpop.xlane.xlu0 %2367 }
0x137f   :  { %v2372_v62 = vmul.f32 0.03125, %v2368_v61  ;;  %v2891_v61 = vld [vmem:[%s4544_s3] sm:$0xff] }
0x1381   :  { %v2374_v0 = vadd.f32 1e-12, %v2372_v62  ;;  %v3697_v62 = vpack.c.bf16 %v2652_v59, %v2651_v57  ;;  %v2980_v57 = vld [vmem:[%s4547_s30 + $0x8] sm:$0xff] }
0x1382   :  { %v2371_v2 = vpop.xlane.xlu0 %2370 }
0x1383   :  { %3821 = vrsqrt.f32 %v2374_v0  ;;  %v2373_v63 = vmul.f32 0.03125, %v2371_v2  ;;  %v2892_v0 = vld [vmem:[%s4544_s3 + $0x8] sm:$0xff]  ;;  %3698 = vmatprep.subr.bf16.mxu1 %v3697_v62 }
0x1384   :  { %v3713_v2 = vpack.c.bf16 %v2892_v0, %v2891_v61 }
0x1385   :  { %v2375_v3 = vadd.f32 1e-12, %v2373_v63  ;;  %v2653_v63 = vld [vmem:[%s4543_s29 + $0x10] sm:$0xff] }
0x1386   :  { %3714 = vmatprep.subr.bf16.mxu0 %v3713_v2 }
0x1387   :  { %3823 = vrsqrt.f32 %v2375_v3  ;;  %v2654_v3 = vld [vmem:[%s4543_s29 + $0x18] sm:$0xff] }
0x138d   :  { %v3822_v4 = vpop.eup %3821 }
0x138e   :  { %v2378_v5 = vmul.f32 %v3822_v4, %v2362_v51  ;;  %v2893_v4 = vld [vmem:[%s4544_s3 + $0x10] sm:$0xff] }
0x1390   :  { %v2386_v7 = vmul.f32 %v3198_v1, %v2378_v5  ;;  %v2894_v5 = vld [vmem:[%s4544_s3 + $0x18] sm:$0xff] }
0x1391   :  { %v3824_v8 = vpop.eup %3823 }
0x1392   :  { %v2379_v9 = vmul.f32 %v3824_v8, %v2363_v50  ;;  %v2394_v10 = vadd.f32 %v3199_v6, %v2386_v7 }
0x1394   :  { %v2387_v12 = vmul.f32 %v3198_v1, %v2379_v9  ;;  %3539 = vmatprep.mubr.msk.f32.mxu1 %vm274_vm3, %v2394_v10  ;;  %v3701_v1 = vpack.c.bf16 %v2654_v3, %v2653_v63 }
0x1396   :  { %v2395_v17 = vadd.f32 %v3199_v6, %v2387_v12  ;;  %v3717_v6 = vpack.c.bf16 %v2894_v5, %v2893_v4 }
0x1398   :  { %3540 = vmatmul.mubr.msk.f32.vlgmr.msra.gmra.mrb[26].mxu1 %vm274_vm3, %v2395_v17 }
0x1399   :  { %3700 = vmatpush3.bf16.msra.mxu1 %v3697_v62 }
0x139a   :  { %3702 = vmatprep.subr.bf16.mxu1 %v3701_v1 }
0x139d   :  { %3704 = vmatpush3.bf16.msra.mxu1 %v3701_v1 }
0x146b   :  { %v3541_v31 = vpop.f32.mrb[26].mxu1 }
0x146c   :  { %v2487_v15 = vadd.f32 %v3541_v31, %v3204_v30  ;;  %v2481_v32 = vpop.f32.mrb[27].mxu1 }
0x146d   :  { %v2482_v33 = vadd.f32 %v3204_v30, %v2481_v32 }
0x146e   :  { %v2493_v34 = vmul.f32 0.70710677, %v2487_v15  ;;  %v2491_v41 = vmul.f32 0.5, %v2487_v15 }
0x146f   :  { %v2492_v35 = vmul.f32 0.70710677, %v2482_v33  ;;  %v2490_v39 = vmul.f32 0.5, %v2482_v33 }
0x1470   :  { %3825 = verf.f32 %v2493_v34 }
0x1471   :  { %3827 = verf.f32 %v2492_v35 }
0x147a   :  { %v3826_v36 = vpop.eup %3825 }
0x147b   :  { %v3828_v37 = vpop.eup %3827  ;;  %v2497_v38 = vadd.f32 1.0, %v3826_v36 }
0x147c   :  { %v2496_v40 = vadd.f32 1.0, %v3828_v37 }
0x147d   :  { %v2499_v43 = vmul.f32 %v2497_v38, %v2491_v41 }
0x147e   :  { %v2498_v42 = vmul.f32 %v2496_v40, %v2490_v39 }
0x1480   :  { %3558 = vmatprep.mubr.msk.f32.mxu0 %vm190_vm0, %v2498_v42 }
0x1481   :  { %3559 = vmatmul.mubr.msk.f32.vlgmr.msra.gmra.mrb[20].mxu0 %vm190_vm0, %v2499_v43 }
0x1482   :  { %3716 = vmatpush3.bf16.msra.mxu0 %v3713_v2 }
0x1483   :  { %3718 = vmatprep.subr.bf16.mxu0 %v3717_v6 }
0x1486   :  { %3720 = vmatpush3.bf16.msra.mxu0 %v3717_v6  ;;  %v3232_v6 = vld [vmem:[#allocation7] ss:$0 sm:$0xff] }
0x1554   :  { %v3560_v45 = vpop.f32.mrb[20].mxu0 }
0x1555   :  { %v2595_v60 = vadd.f32 %v3560_v45, %v3215_v44  ;;  %v2589_v11 = vpop.f32.mrb[21].mxu0 }
0x1556   :  { %v2590_v58 = vadd.f32 %v3215_v44, %v2589_v11 }
0x1557   :  { %v2599_v46 = vadd.f32 %v2595_v60, %v2395_v17 }
0x1558   :  { %v2598_v47 = vadd.f32 %v2590_v58, %v2394_v10 }
0x1559   :  { %v2607_v48 = vsel %vm274_vm3, %v2599_v46, 0.0 }
0x155a   :  { %2608 = vadd.xlane.f32.xlu0 %v2607_v48  ;;  %v2604_v49 = vsel %vm274_vm3, %v2598_v47, 0.0 }
0x155b   :  { %2605 = vadd.xlane.f32.xlu1 %v2604_v49 }
0x15e7   :  { %v2609_v50 = vpop.xlane.xlu0 %2608 }
0x15e8   :  { %v2611_v51 = vmul.f32 0.03125, %v2609_v50  ;;  %v2606_v52 = vpop.xlane.xlu1 %2605 }
0x15e9   :  { %v2610_v13 = vmul.f32 0.03125, %v2606_v52 }
0x15ea   :  { %v2613_v14 = vsub.f32 %v2599_v46, %v2611_v51 }
0x15eb   :  { %v2612_v24 = vsub.f32 %v2598_v47, %v2610_v13  ;;  %v2797_v13 = vld [vmem:[%s4546_s14] sm:$0xff] }
0x15ec   :  { %v2615_v53 = vmul.f32 %v2613_v14, %v2613_v14 }
0x15ed   :  { %v2614_v54 = vmul.f32 %v2612_v24, %v2612_v24 }
0x15ee   :  { %v2619_v55 = vsel %vm274_vm3, %v2615_v53, 0.0  ;;  %v2799_v53 = vld [vmem:[%s4546_s14 + $0x10] sm:$0xff] }
0x15ef   :  { %2620 = vadd.xlane.f32.xlu0 %v2619_v55  ;;  %v2616_v56 = vsel %vm274_vm3, %v2614_v54, 0.0  ;;  %v2800_v54 = vld [vmem:[%s4546_s14 + $0x18] sm:$0xff] }
0x15f0   :  { %2617 = vadd.xlane.f32.xlu1 %v2616_v56  ;;  %v3709_v55 = vpack.c.bf16 %v2800_v54, %v2799_v53  ;;  %v2979_v56 = vld [vmem:[%s4547_s30] sm:$0xff] }
0x15f1   :  { %v3721_v59 = vpack.c.bf16 %v2980_v57, %v2979_v56 }
0x167c   :  { %v2621_v7 = vpop.xlane.xlu0 %2620 }
0x167d   :  { %v2623_v8 = vmul.f32 0.03125, %v2621_v7  ;;  %v2618_v9 = vpop.xlane.xlu1 %2617 }
0x167e   :  { %v2622_v10 = vmul.f32 0.03125, %v2618_v9  ;;  %v3228_v9 = vld [vmem:[%s4549_s28] ss:$0 sm:$0xff] }
0x167f   :  { %v2625_v12 = vadd.f32 1e-12, %v2623_v8 }
0x1680   :  { %v2624_v17 = vadd.f32 1e-12, %v2622_v10 }
0x1681   :  { %3829 = vrsqrt.f32 %v2625_v12 }
0x1682   :  { %3831 = vrsqrt.f32 %v2624_v17 }
0x168b   :  { %v3830_v18 = vpop.eup %3829 }
0x168c   :  { %v3832_v20 = vpop.eup %3831  ;;  %v2629_v21 = vmul.f32 %v3830_v18, %v2613_v14  ;;  %v2798_v14 = vld [vmem:[%s4546_s14 + $0x8] sm:$0xff] }
0x168d   :  { %v2628_v23 = vmul.f32 %v3832_v20, %v2612_v24  ;;  %v3705_v24 = vpack.c.bf16 %v2798_v14, %v2797_v13 }
0x168e   :  { %v2637_v16 = vmul.f32 %v3220_v19, %v2629_v21 }
0x168f   :  { %v2636_v25 = vmul.f32 %v3220_v19, %v2628_v23  ;;  %3706 = vmatprep.subr.bf16.mxu1 %v3705_v24 }
0x1690   :  { %v2645_v26 = vadd.f32 %v3221_v22, %v2637_v16 }
0x1691   :  { %v2644_v27 = vadd.f32 %v3221_v22, %v2636_v25 }
0x1692   :  { %3223 = vst.msk [vmem:[%s4130_s27 + $0x28] sm:$0xff] %vm274_vm3, %v2645_v26  ;;  %2650 = vst.msk [vmem:[#allocation8 + $0x8] sm:$0xff] %vm274_vm3, %v2645_v26 }
0x1693   :  { %3222 = vst.msk [vmem:[%s4130_s27 + $0x20] sm:$0xff] %vm274_vm3, %v2644_v27  ;;  %3569 = vmatprep.mubr.msk.f32.mxu1 %vm274_vm3, %v2644_v27  ;;  %2649 = vst.msk [vmem:[#allocation8] sm:$0xff] %vm274_vm3, %v2644_v27  ;;  %3591 = vmatprep.mubr.msk.f32.mxu0 %vm274_vm3, %v2644_v27  ;;  %s4548_s27 = sld [smem:[#allocation19_spill]] }
0x1694   :  { %3570 = vmatmul.mubr.msk.f32.vlgmr.msra.gmra.mrb[28].mxu1 %vm274_vm3, %v2645_v26  ;;  %3592 = vmatmul.mubr.msk.f32.vlgmr.msra.gmra.mrb[22].mxu0 %vm274_vm3, %v2645_v26 }
0x1695   :  { %3708 = vmatpush3.bf16.msra.mxu1 %v3705_v24 }
0x1696   :  { %3710 = vmatprep.subr.bf16.mxu1 %v3709_v55 }
0x1699   :  { %3712 = vmatpush3.bf16.msra.mxu1 %v3709_v55  ;;  %v3227_v1 = vld [vmem:[%s4548_s27] ss:$0 sm:$0xff] }
0x169a   :  { %3722 = vmatprep.subr.bf16.mxu1 %v3721_v59 }
0x1767   :  { %v3571_v29 = vpop.f32.mrb[28].mxu1  ;;  %v4485_v30 = vpop.f32.mrb[22].mxu0 }
0x1768   :  { %v2740_v31 = vadd.f32 %v3571_v29, %v3224_v28  ;;  %v2734_v15 = vpop.f32.mrb[29].mxu1  ;;  %v2968_v32 = vpop.f32.mrb[23].mxu0  ;;  %v2974_v19 = vadd.f32 %v4485_v30, %v3232_v6 }
0x1769   :  { %v2735_v33 = vadd.f32 %v3224_v28, %v2734_v15  ;;  %v2969_v12 = vadd.f32 %v3232_v6, %v2968_v32 }
0x176a   :  { %v2746_v34 = vmul.f32 0.70710677, %v2740_v31  ;;  %v2744_v38 = vmul.f32 0.5, %v2740_v31  ;;  %v2978_v22 = vmax.f32 %v2974_v19, 0.0 }
0x176b   :  { %v2745_v35 = vmul.f32 0.70710677, %v2735_v33  ;;  %v2743_v40 = vmul.f32 0.5, %v2735_v33  ;;  %v2977_v21 = vmax.f32 %v2969_v12, 0.0 }
0x176c   :  { %3833 = verf.f32 %v2746_v34 }
0x176d   :  { %3835 = verf.f32 %v2745_v35 }
0x1776   :  { %v3834_v36 = vpop.eup %3833 }
0x1777   :  { %v3836_v37 = vpop.eup %3835  ;;  %v2750_v39 = vadd.f32 1.0, %v3834_v36 }
0x1778   :  { %v2749_v41 = vadd.f32 1.0, %v3836_v37 }
0x1779   :  { %v2752_v42 = vmul.f32 %v2750_v39, %v2744_v38 }
0x177a   :  { %v2751_v43 = vmul.f32 %v2749_v41, %v2743_v40 }
0x177b   :  { %v2758_v44 = vsel %vm274_vm3, %v2752_v42, 0.0 }
0x177c   :  { %2759 = vadd.xlane.f32.xlu0 %v2758_v44  ;;  %v2755_v45 = vsel %vm274_vm3, %v2751_v43, 0.0 }
0x177d   :  { %2756 = vadd.xlane.f32.xlu1 %v2755_v45 }
0x1809   :  { %v2760_v60 = vpop.xlane.xlu0 %2759 }
0x180a   :  { %v2762_v11 = vmul.f32 0.03125, %v2760_v60  ;;  %v2757_v58 = vpop.xlane.xlu1 %2756 }
0x180b   :  { %v2761_v46 = vmul.f32 0.03125, %v2757_v58 }
0x180c   :  { %v2764_v47 = vsub.f32 %v2752_v42, %v2762_v11 }
0x180d   :  { %v2763_v48 = vsub.f32 %v2751_v43, %v2761_v46 }
0x180e   :  { %v2766_v49 = vmul.f32 %v2764_v47, %v2764_v47 }
0x180f   :  { %v2765_v50 = vmul.f32 %v2763_v48, %v2763_v48 }
0x1810   :  { %v2770_v51 = vsel %vm274_vm3, %v2766_v49, 0.0 }
0x1811   :  { %2771 = vadd.xlane.f32.xlu0 %v2770_v51  ;;  %v2767_v52 = vsel %vm274_vm3, %v2765_v50, 0.0 }
0x1812   :  { %2768 = vadd.xlane.f32.xlu1 %v2767_v52 }
0x189e   :  { %v2772_v61 = vpop.xlane.xlu0 %2771 }
0x189f   :  { %v2774_v62 = vmul.f32 0.03125, %v2772_v61  ;;  %v2769_v0 = vpop.xlane.xlu1 %2768 }
0x18a0   :  { %v2773_v2 = vmul.f32 0.03125, %v2769_v0 }
0x18a1   :  { %v2776_v63 = vadd.f32 1e-12, %v2774_v62 }
0x18a2   :  { %v2775_v3 = vadd.f32 1e-12, %v2773_v2 }
0x18a3   :  { %3837 = vrsqrt.f32 %v2776_v63 }
0x18a4   :  { %3839 = vrsqrt.f32 %v2775_v3 }
0x18ad   :  { %v3838_v4 = vpop.eup %3837 }
0x18ae   :  { %v3840_v5 = vpop.eup %3839  ;;  %v2780_v7 = vmul.f32 %v3838_v4, %v2764_v47 }
0x18af   :  { %v2779_v8 = vmul.f32 %v3840_v5, %v2763_v48 }
0x18b0   :  { %v2788_v10 = vmul.f32 %v3227_v1, %v2780_v7 }
0x18b1   :  { %v2787_v17 = vmul.f32 %v3227_v1, %v2779_v8 }
0x18b2   :  { %v2796_v20 = vadd.f32 %v3228_v9, %v2788_v10 }
0x18b3   :  { %v2795_v18 = vadd.f32 %v3228_v9, %v2787_v17 }
0x18b5   :  { %3580 = vmatprep.mubr.msk.f32.mxu1 %vm274_vm3, %v2795_v18 }
0x18b6   :  { %3581 = vmatmul.mubr.msk.f32.vlgmr.msra.gmra.mrb[30].mxu1 %vm274_vm3, %v2796_v20 }
0x18b7   :  { %3724 = vmatpush3.bf16.msra.mxu1 %v3721_v59  ;;  %3598 = vmatprep.mubr.msk.f32.mxu1 %vm416_vm5, %v2977_v21 }
0x18ba   :  { %3599 = vmatmul.mubr.msk.f32.vlgmr.msra.gmra.mrb[32].mxu1 %vm416_vm5, %v2978_v22 }
0x18bb   :  { %3918 = shalt.err (!%p3915_p0)
}
0x18bc   :  { %s3919_s7 = scalar_lea.hbm %s4135_s19, 256 }
0x18bd   :  { %p3920_p1 = scmp.ne.s32.totalorder %s4135_s19, %s3919_s7  ;;  %p3923_p2 = scmp.lt.u32.totalorder %s3919_s7, %s4135_s19 }
0x18bf   :  { %p3925_p3 = pnand %p3923_p2, %p3920_p1 }
0x18c1   :  { %3928 = shalt.err (!%p3925_p3)
}
0x18c2   :  { %s3980_s10 = smov 128   ;;  %s4550_s11 = sld [smem:[#allocation22_spill]] }
0x18c3   :  { %s4551_s20 = sld [smem:[#allocation25_spill]]  ;;  %s3981_s15 = smov 8  }
0x18c4   :  { %3084 = dma.vmem_to_hbm [thread:$0]  %s3079_s0, 256, %s4135_s19, [#allocation4], %s3980_s10, %s3980_s10, %s3981_s15  }
0x18c8   :  { %v3229_v23 = vld [vmem:[%s4550_s11] ss:$0 sm:$0xff] }
0x18c9   :  { %v3235_v28 = vld [vmem:[%s4551_s20] ss:$0 sm:$0xff] }
0x1989   :  { %v3582_v16 = vpop.f32.mrb[30].mxu1 }
0x198a   :  { %v2886_v25 = vadd.f32 %v3582_v16, %v3229_v23  ;;  %v2880_v26 = vpop.f32.mrb[31].mxu1 }
0x198b   :  { %v2881_v27 = vadd.f32 %v3229_v23, %v2880_v26 }
0x198c   :  { %2890 = vst [vmem:[%s4140_s12 + $0x8] sm:$0xff] %v2886_v25 }
0x198d   :  { %2889 = vst [vmem:[%s4140_s12] sm:$0xff] %v2881_v27  ;;  %v3600_v29 = vpop.f32.mrb[32].mxu1 }
0x198e   :  { %v3066_v30 = vadd.f32 %v3600_v29, %v3235_v28  ;;  %v3060_v31 = vpop.f32.mrb[33].mxu1 }
0x198f   :  { %v3061_v15 = vadd.f32 %v3235_v28, %v3060_v31 }
0x1990   :  { %3070 = vst [vmem:[%s4145_s24 + $0x8] sm:$0xff] %v3066_v30 }
0x1991   :  { %3069 = vst [vmem:[%s4145_s24] sm:$0xff] %v3061_v15 }
0x1992   :  { %3933 = dma.done.wait [#allocation4], 256  }
0x1993   :  { %3934 = vsyncadd [#allocation4], 4294967040 }
0x1994   :  { %3098 = vsyncpa [#allocation3], 1 }
0x1995   :  { %3099 = vsyncpa [#allocation6], 1 }
0x1996   :  { %3100 = vsyncpa [#allocation4], 1 }

</bundles_post_ra>
